<compile_context>
chip_gen: v6e
topology: v6e:2x2x1
jax: 0.10.0
libtpu: 0.0.40
codegen_flags: <defaults>
</compile_context>

<pallas_src>
import jax
import jax.numpy as jnp
import numpy as np
from jax.experimental import pallas as pl
from jax.experimental.pallas import tpu as pltpu


def pointer_network_kernel(
    init_ref,    # (1, 2dh, 1)   per-problem init state (column)
    match_ref,   # (1, 2dh, N)   per-problem match matrix, transposed
    w1a_ref,     # (dh, 2dh)     scorer Linear0 weight, "state" half
    w1b_ref,     # (dh, 2dh)     scorer Linear0 weight, "match" half
    b1_ref,      # (dh, 1)
    w2_ref,      # (dh, 1)       scorer Linear2 weight (b2 dropped)
    wc_i_ref,    # (2dh, 2dh)    fused (W_ih[:, :2dh] + W_hh) for gate i
    wc_f_ref,    # (2dh, 2dh)    ... gate f
    wc_g_ref,    # (2dh, 2dh)    ... gate g
    wb_i_ref,    # (2dh, 2dh)    W_ih[:, 2dh:] for gate i
    wb_f_ref,    # (2dh, 2dh)    ... gate f
    wb_g_ref,    # (2dh, 2dh)    ... gate g
    bi_ref,      # (2dh, 1)      b_ih + b_hh for gate i
    bf_ref,      # (2dh, 1)      ... gate f
    bg_ref,      # (2dh, 1)      ... gate g
    out_ref,     # (1, 2, N)     row 0 = p1, row 1 = p2
):
  init_col = init_ref[0]            # (2dh, 1)
  match_t = match_ref[0]            # (2dh, N)

  # Hoisted: identical in both pointer calls (match, w1b, b1 never change).
  mb = (jnp.dot(w1b_ref[...], match_t, preferred_element_type=jnp.float32)
        + b1_ref[...])                                            # (dh, N)
  w2_col = w2_ref[...]                                            # (dh, 1)

  def pointer(state_col):
    # scorer(cat([state_rep, match], 1)) without materializing the concat:
    # cat @ W1^T == W1[:, :2dh] @ state  +  W1[:, 2dh:] @ match^T  (transposed)
    sa = jnp.dot(w1a_ref[...], state_col,
                 preferred_element_type=jnp.float32)              # (dh, 1)
    h_t = jnp.tanh(mb + sa)                                       # (dh, N)
    # logits^T = w2 @ h^T, done as VPU multiply + sublane reduce -> (1, N)
    logits = jnp.sum(h_t * w2_col, axis=0, keepdims=True)         # (1, N)
    m = jnp.max(logits, axis=-1, keepdims=True)                   # (1, 1)
    e = jnp.exp(logits - m)
    denom = jnp.sum(e, axis=-1, keepdims=True)                    # (1, 1)
    s = e * pl.reciprocal(denom, approx=False)                    # (1, N)
    # (s * cat).sum(0): state-half is state (sum(s)==1); match-half below.
    wmatch_col = jnp.sum(match_t * s, axis=-1, keepdims=True)     # (2dh, 1)
    return wmatch_col, s

  # ---- first pointer step ---------------------------------------------------
  wmatch1, s1 = pointer(init_col)

  # ---- LSTMCell(cat([init, wmatch1]), (init, init)); keep only cell state ---
  def gate(wc_ref, wb_ref, b_ref):
    return (jnp.dot(wc_ref[...], init_col, preferred_element_type=jnp.float32)
            + jnp.dot(wb_ref[...], wmatch1, preferred_element_type=jnp.float32)
            + b_ref[...])                                         # (2dh, 1)

  i_g = jax.nn.sigmoid(gate(wc_i_ref, wb_i_ref, bi_ref))
  f_g = jax.nn.sigmoid(gate(wc_f_ref, wb_f_ref, bf_ref))
  g_g = jnp.tanh(gate(wc_g_ref, wb_g_ref, bg_ref))
  # output gate unused: forward() keeps the *cell* state (second LSTM output)
  c_new = f_g * init_col + i_g * g_g                              # (2dh, 1)

  # ---- second pointer step --------------------------------------------------
  _, s2 = pointer(c_new)

  # Single lane-dense store of both probability rows.
  out_ref[0] = jnp.concatenate([s1, s2], axis=0)                  # (2, N)


def pointer_network_forward(init_b, match_b, kparams):
  """init_b: (B, 2dh), match_b: (B, N, 2dh) -> (p1, p2), each (B, N)."""
  B, d2 = init_b.shape
  N = match_b.shape[1]

  init_col_b = init_b.reshape(B, d2, 1).astype(jnp.float32)
  match_t_b = jnp.transpose(match_b, (0, 2, 1)).astype(jnp.float32)  # (B,2dh,N)

  def weight_spec(w):
    return pl.BlockSpec(w.shape, lambda b: (0, 0))

  in_specs = [
      pl.BlockSpec((1, d2, 1), lambda b: (b, 0, 0)),
      pl.BlockSpec((1, d2, N), lambda b: (b, 0, 0)),
  ] + [weight_spec(w) for w in kparams]
  out_spec = pl.BlockSpec((1, 2, N), lambda b: (b, 0, 0))

  out = pl.pallas_call(
      pointer_network_kernel,
      out_shape=jax.ShapeDtypeStruct((B, 2, N), jnp.float32),
      grid=(B,),
      in_specs=in_specs,
      out_specs=out_spec,
      compiler_params=pltpu.CompilerParams(
          dimension_semantics=("parallel",)),
  )(init_col_b, match_t_b, *kparams)

  return out[:, 0, :], out[:, 1, :]


def make_params(key, dh):
  """Deterministic synthetic parameters shaped like the PyTorch module."""
  din, d2 = 4 * dh, 2 * dh
  ks = jax.random.split(key, 8)
  s = 0.1
  return dict(
      w1=s * jax.random.normal(ks[0], (dh, din), jnp.float32),    # Linear(din, dh)
      b1=s * jax.random.normal(ks[1], (dh,), jnp.float32),
      w2=s * jax.random.normal(ks[2], (1, dh), jnp.float32),      # Linear(dh, 1)
      b2=s * jax.random.normal(ks[3], (1,), jnp.float32),
      wih=s * jax.random.normal(ks[4], (4 * d2, din), jnp.float32),  # LSTMCell
      whh=s * jax.random.normal(ks[5], (4 * d2, d2), jnp.float32),
      b_ih=s * jax.random.normal(ks[6], (4 * d2,), jnp.float32),
      b_hh=s * jax.random.normal(ks[7], (4 * d2,), jnp.float32),
  )


def prepare_kernel_params(p):
  """Rearrange PyTorch-shaped params into the kernel's lane-major operands."""
  w1, b1, w2 = p["w1"], p["b1"], p["w2"]
  wih, whh = p["wih"], p["whh"]
  bl = p["b_ih"] + p["b_hh"]
  dh = w1.shape[0]
  d2 = 2 * dh

  w1a = w1[:, :d2]                       # (dh, 2dh) - state half
  w1b = w1[:, d2:]                       # (dh, 2dh) - match half
  b1c = b1.reshape(dh, 1)
  w2c = w2.reshape(dh, 1)                # b2 dropped: softmax shift-invariant

  def gate_block(k):                     # PyTorch gate order: i, f, g, (o dropped)
    r0, r1 = k * d2, (k + 1) * d2
    wc = wih[r0:r1, :d2] + whh[r0:r1, :]   # fused init terms (2dh, 2dh)
    wb = wih[r0:r1, d2:]                   # wmatch term      (2dh, 2dh)
    bc = bl[r0:r1].reshape(d2, 1)
    return wc, wb, bc

  wc_i, wb_i, b_i = gate_block(0)
  wc_f, wb_f, b_f = gate_block(1)
  wc_g, wb_g, b_g = gate_block(2)

  return (w1a, w1b, b1c, w2c,
          wc_i, wc_f, wc_g,
          wb_i, wb_f, wb_g,
          b_i, b_f, b_g)


def ref_forward(init, match, p):
  """Pure-JAX reference mirroring the PyTorch eval-mode forward (per problem)."""
  w1, b1, w2, b2 = p["w1"], p["b1"], p["w2"], p["b2"]
  wih, whh, b_ih, b_hh = p["wih"], p["whh"], p["b_ih"], p["b_hh"]
  N = match.shape[0]
  d2 = init.shape[0]

  def pointer(state):
    rep = jnp.broadcast_to(state[None, :], (N, d2))
    cat = jnp.concatenate([rep, match], axis=1)
    h = jnp.tanh(cat @ w1.T + b1)
    logits = h @ w2.T + b2
    sm = jax.nn.softmax(logits, axis=0)
    return (sm * cat).sum(0), sm[:, 0]

  start, p1 = pointer(init)
  gates = start @ wih.T + init @ whh.T + b_ih + b_hh
  i = jax.nn.sigmoid(gates[:d2])
  f = jax.nn.sigmoid(gates[d2:2 * d2])
  g = jnp.tanh(gates[2 * d2:3 * d2])
  c = f * init + i * g
  _, p2 = pointer(c)
  return p1, p2


if __name__ == "__main__":
  dh = 32        # module hidden size -> init dim 2*dh = 64, match feat 2*dh
  N = 8          # number of match rows (sequence length)
  B = 2          # batch of independent problems handled by the grid

  key = jax.random.PRNGKey(0)
  k_init, k_match, k_par = jax.random.split(key, 3)
  init_b = jax.random.normal(k_init, (B, 2 * dh), jnp.float32)
  match_b = jax.random.normal(k_match, (B, N, 2 * dh), jnp.float32)

  torch_params = make_params(k_par, dh)
  kparams = prepare_kernel_params(torch_params)

  p1, p2 = pointer_network_forward(init_b, match_b, kparams)
  jax.block_until_ready((p1, p2))

  for b in range(B):
    r1, r2 = ref_forward(init_b[b], match_b[b], torch_params)
    np.testing.assert_allclose(np.asarray(p1[b]), np.asarray(r1),
                               rtol=1e-4, atol=1e-5)
    np.testing.assert_allclose(np.asarray(p2[b]), np.asarray(r2),
                               rtol=1e-4, atol=1e-5)

  print("KERNEL_OK")
</pallas_src>

<mosaic_0001>
module attributes {stable_mosaic.version = 11 : i64} {
  func.func @pointer_network_kernel(%arg0: i32, %arg1: memref<1x64x1xf32, #tpu.memory_space<vmem>>, %arg2: memref<1x64x8xf32, #tpu.memory_space<vmem>>, %arg3: memref<32x64xf32, #tpu.memory_space<vmem>>, %arg4: memref<32x64xf32, #tpu.memory_space<vmem>>, %arg5: memref<32x1xf32, #tpu.memory_space<vmem>>, %arg6: memref<32x1xf32, #tpu.memory_space<vmem>>, %arg7: memref<64x64xf32, #tpu.memory_space<vmem>>, %arg8: memref<64x64xf32, #tpu.memory_space<vmem>>, %arg9: memref<64x64xf32, #tpu.memory_space<vmem>>, %arg10: memref<64x64xf32, #tpu.memory_space<vmem>>, %arg11: memref<64x64xf32, #tpu.memory_space<vmem>>, %arg12: memref<64x64xf32, #tpu.memory_space<vmem>>, %arg13: memref<64x1xf32, #tpu.memory_space<vmem>>, %arg14: memref<64x1xf32, #tpu.memory_space<vmem>>, %arg15: memref<64x1xf32, #tpu.memory_space<vmem>>, %arg16: memref<1x2x8xf32, #tpu.memory_space<vmem>>) attributes {dimension_semantics = [#tpu.dimension_semantics<parallel>], iteration_bounds = array<i64: 2>, scalar_prefetch = 0 : i64, scratch_operands = 0 : i64, tpu.core_type = #tpu.core_type<tc>, window_params = [{transform_indices = @transform_0, window_bounds = array<i64: 1, 64, 1>}, {transform_indices = @transform_1, window_bounds = array<i64: 1, 64, 8>}, {pipeline_mode = #tpu.pipeline_mode<synchronous>, transform_indices = @transform_2, window_bounds = array<i64: 32, 64>}, {pipeline_mode = #tpu.pipeline_mode<synchronous>, transform_indices = @transform_3, window_bounds = array<i64: 32, 64>}, {pipeline_mode = #tpu.pipeline_mode<synchronous>, transform_indices = @transform_4, window_bounds = array<i64: 32, 1>}, {pipeline_mode = #tpu.pipeline_mode<synchronous>, transform_indices = @transform_5, window_bounds = array<i64: 32, 1>}, {pipeline_mode = #tpu.pipeline_mode<synchronous>, transform_indices = @transform_6, window_bounds = array<i64: 64, 64>}, {pipeline_mode = #tpu.pipeline_mode<synchronous>, transform_indices = @transform_7, window_bounds = array<i64: 64, 64>}, {pipeline_mode = #tpu.pipeline_mode<synchronous>, transform_indices = @transform_8, window_bounds = array<i64: 64, 64>}, {pipeline_mode = #tpu.pipeline_mode<synchronous>, transform_indices = @transform_9, window_bounds = array<i64: 64, 64>}, {pipeline_mode = #tpu.pipeline_mode<synchronous>, transform_indices = @transform_10, window_bounds = array<i64: 64, 64>}, {pipeline_mode = #tpu.pipeline_mode<synchronous>, transform_indices = @transform_11, window_bounds = array<i64: 64, 64>}, {pipeline_mode = #tpu.pipeline_mode<synchronous>, transform_indices = @transform_12, window_bounds = array<i64: 64, 1>}, {pipeline_mode = #tpu.pipeline_mode<synchronous>, transform_indices = @transform_13, window_bounds = array<i64: 64, 1>}, {pipeline_mode = #tpu.pipeline_mode<synchronous>, transform_indices = @transform_14, window_bounds = array<i64: 64, 1>}, {transform_indices = @transform_15, window_bounds = array<i64: 1, 2, 8>}]} {
    %c0 = arith.constant 0 : index
    %c0_0 = arith.constant 0 : index
    %c0_1 = arith.constant 0 : index
    %0 = vector.load %arg1[%c0, %c0_0, %c0_1] : memref<1x64x1xf32, #tpu.memory_space<vmem>>, vector<1x64x1xf32>
    %1 = vector.shape_cast %0 : vector<1x64x1xf32> to vector<64x1xf32>
    %c0_2 = arith.constant 0 : index
    %c0_3 = arith.constant 0 : index
    %c0_4 = arith.constant 0 : index
    %2 = vector.load %arg2[%c0_2, %c0_3, %c0_4] : memref<1x64x8xf32, #tpu.memory_space<vmem>>, vector<1x64x8xf32>
    %3 = vector.shape_cast %2 : vector<1x64x8xf32> to vector<64x8xf32>
    %c0_5 = arith.constant 0 : index
    %c0_6 = arith.constant 0 : index
    %4 = vector.load %arg4[%c0_5, %c0_6] : memref<32x64xf32, #tpu.memory_space<vmem>>, vector<32x64xf32>
    %cst = arith.constant dense<0.000000e+00> : vector<32x8xf32>
    %5 = tpu.matmul %4, %3, %cst {dimension_numbers = #tpu.dot_dimension_numbers<[1], [0], [0], [1], [0, 0, 1, 1], [], []>} : vector<32x64xf32>, vector<64x8xf32>, vector<32x8xf32> -> vector<32x8xf32>
    %c0_7 = arith.constant 0 : index
    %c0_8 = arith.constant 0 : index
    %6 = vector.load %arg5[%c0_7, %c0_8] : memref<32x1xf32, #tpu.memory_space<vmem>>, vector<32x1xf32>
    %7 = vector.broadcast %6 : vector<32x1xf32> to vector<32x8xf32>
    %8 = arith.addf %5, %7 : vector<32x8xf32>
    %c0_9 = arith.constant 0 : index
    %c0_10 = arith.constant 0 : index
    %9 = vector.load %arg6[%c0_9, %c0_10] : memref<32x1xf32, #tpu.memory_space<vmem>>, vector<32x1xf32>
    %c0_11 = arith.constant 0 : index
    %c0_12 = arith.constant 0 : index
    %10 = vector.load %arg3[%c0_11, %c0_12] : memref<32x64xf32, #tpu.memory_space<vmem>>, vector<32x64xf32>
    %cst_13 = arith.constant dense<0.000000e+00> : vector<32x1xf32>
    %11 = tpu.matmul %10, %1, %cst_13 {dimension_numbers = #tpu.dot_dimension_numbers<[1], [0], [0], [1], [0, 0, 1, 1], [], []>} : vector<32x64xf32>, vector<64x1xf32>, vector<32x1xf32> -> vector<32x1xf32>
    %12 = vector.broadcast %11 : vector<32x1xf32> to vector<32x8xf32>
    %13 = arith.addf %8, %12 : vector<32x8xf32>
    %14 = math.tanh %13 : vector<32x8xf32>
    %15 = vector.broadcast %9 : vector<32x1xf32> to vector<32x8xf32>
    %16 = arith.mulf %14, %15 : vector<32x8xf32>
    %cst_14 = arith.constant dense<0.000000e+00> : vector<8xf32>
    %17 = vector.multi_reduction <add>, %16, %cst_14 [0] : vector<32x8xf32> to vector<8xf32>
    %18 = vector.shape_cast %17 : vector<8xf32> to vector<1x8xf32>
    %cst_15 = arith.constant dense<0xFF800000> : vector<1xf32>
    %19 = vector.multi_reduction <maximumf>, %18, %cst_15 [1] : vector<1x8xf32> to vector<1xf32>
    %20 = vector.shape_cast %19 : vector<1xf32> to vector<1x1xf32>
    %21 = vector.broadcast %20 : vector<1x1xf32> to vector<1x8xf32>
    %22 = arith.subf %18, %21 : vector<1x8xf32>
    %23 = math.exp %22 : vector<1x8xf32>
    %cst_16 = arith.constant dense<0.000000e+00> : vector<1xf32>
    %24 = vector.multi_reduction <add>, %23, %cst_16 [1] : vector<1x8xf32> to vector<1xf32>
    %25 = vector.shape_cast %24 : vector<1xf32> to vector<1x1xf32>
    %26 = tpu.reciprocal %25 : vector<1x1xf32> -> vector<1x1xf32>
    %27 = vector.broadcast %26 : vector<1x1xf32> to vector<1x8xf32>
    %28 = arith.mulf %23, %27 : vector<1x8xf32>
    %29 = vector.broadcast %28 : vector<1x8xf32> to vector<64x8xf32>
    %30 = arith.mulf %3, %29 : vector<64x8xf32>
    %cst_17 = arith.constant dense<0.000000e+00> : vector<64xf32>
    %31 = vector.multi_reduction <add>, %30, %cst_17 [1] : vector<64x8xf32> to vector<64xf32>
    %32 = vector.shape_cast %31 : vector<64xf32> to vector<64x1xf32>
    %c0_18 = arith.constant 0 : index
    %c0_19 = arith.constant 0 : index
    %33 = vector.load %arg7[%c0_18, %c0_19] : memref<64x64xf32, #tpu.memory_space<vmem>>, vector<64x64xf32>
    %cst_20 = arith.constant dense<0.000000e+00> : vector<64x1xf32>
    %34 = tpu.matmul %33, %1, %cst_20 {dimension_numbers = #tpu.dot_dimension_numbers<[1], [0], [0], [1], [0, 0, 1, 1], [], []>} : vector<64x64xf32>, vector<64x1xf32>, vector<64x1xf32> -> vector<64x1xf32>
    %c0_21 = arith.constant 0 : index
    %c0_22 = arith.constant 0 : index
    %35 = vector.load %arg10[%c0_21, %c0_22] : memref<64x64xf32, #tpu.memory_space<vmem>>, vector<64x64xf32>
    %cst_23 = arith.constant dense<0.000000e+00> : vector<64x1xf32>
    %36 = tpu.matmul %35, %32, %cst_23 {dimension_numbers = #tpu.dot_dimension_numbers<[1], [0], [0], [1], [0, 0, 1, 1], [], []>} : vector<64x64xf32>, vector<64x1xf32>, vector<64x1xf32> -> vector<64x1xf32>
    %37 = arith.addf %34, %36 : vector<64x1xf32>
    %c0_24 = arith.constant 0 : index
    %c0_25 = arith.constant 0 : index
    %38 = vector.load %arg13[%c0_24, %c0_25] : memref<64x1xf32, #tpu.memory_space<vmem>>, vector<64x1xf32>
    %39 = arith.addf %37, %38 : vector<64x1xf32>
    %40 = arith.negf %39 : vector<64x1xf32>
    %41 = math.exp %40 : vector<64x1xf32>
    %cst_26 = arith.constant 1.000000e+00 : f32
    %42 = vector.broadcast %cst_26 : f32 to vector<64x1xf32>
    %43 = arith.addf %42, %41 : vector<64x1xf32>
    %44 = arith.divf %42, %43 : vector<64x1xf32>
    %c0_27 = arith.constant 0 : index
    %c0_28 = arith.constant 0 : index
    %45 = vector.load %arg8[%c0_27, %c0_28] : memref<64x64xf32, #tpu.memory_space<vmem>>, vector<64x64xf32>
    %cst_29 = arith.constant dense<0.000000e+00> : vector<64x1xf32>
    %46 = tpu.matmul %45, %1, %cst_29 {dimension_numbers = #tpu.dot_dimension_numbers<[1], [0], [0], [1], [0, 0, 1, 1], [], []>} : vector<64x64xf32>, vector<64x1xf32>, vector<64x1xf32> -> vector<64x1xf32>
    %c0_30 = arith.constant 0 : index
    %c0_31 = arith.constant 0 : index
    %47 = vector.load %arg11[%c0_30, %c0_31] : memref<64x64xf32, #tpu.memory_space<vmem>>, vector<64x64xf32>
    %cst_32 = arith.constant dense<0.000000e+00> : vector<64x1xf32>
    %48 = tpu.matmul %47, %32, %cst_32 {dimension_numbers = #tpu.dot_dimension_numbers<[1], [0], [0], [1], [0, 0, 1, 1], [], []>} : vector<64x64xf32>, vector<64x1xf32>, vector<64x1xf32> -> vector<64x1xf32>
    %49 = arith.addf %46, %48 : vector<64x1xf32>
    %c0_33 = arith.constant 0 : index
    %c0_34 = arith.constant 0 : index
    %50 = vector.load %arg14[%c0_33, %c0_34] : memref<64x1xf32, #tpu.memory_space<vmem>>, vector<64x1xf32>
    %51 = arith.addf %49, %50 : vector<64x1xf32>
    %52 = arith.negf %51 : vector<64x1xf32>
    %53 = math.exp %52 : vector<64x1xf32>
    %cst_35 = arith.constant 1.000000e+00 : f32
    %54 = vector.broadcast %cst_35 : f32 to vector<64x1xf32>
    %55 = arith.addf %54, %53 : vector<64x1xf32>
    %56 = arith.divf %54, %55 : vector<64x1xf32>
    %c0_36 = arith.constant 0 : index
    %c0_37 = arith.constant 0 : index
    %57 = vector.load %arg9[%c0_36, %c0_37] : memref<64x64xf32, #tpu.memory_space<vmem>>, vector<64x64xf32>
    %cst_38 = arith.constant dense<0.000000e+00> : vector<64x1xf32>
    %58 = tpu.matmul %57, %1, %cst_38 {dimension_numbers = #tpu.dot_dimension_numbers<[1], [0], [0], [1], [0, 0, 1, 1], [], []>} : vector<64x64xf32>, vector<64x1xf32>, vector<64x1xf32> -> vector<64x1xf32>
    %c0_39 = arith.constant 0 : index
    %c0_40 = arith.constant 0 : index
    %59 = vector.load %arg12[%c0_39, %c0_40] : memref<64x64xf32, #tpu.memory_space<vmem>>, vector<64x64xf32>
    %cst_41 = arith.constant dense<0.000000e+00> : vector<64x1xf32>
    %60 = tpu.matmul %59, %32, %cst_41 {dimension_numbers = #tpu.dot_dimension_numbers<[1], [0], [0], [1], [0, 0, 1, 1], [], []>} : vector<64x64xf32>, vector<64x1xf32>, vector<64x1xf32> -> vector<64x1xf32>
    %61 = arith.addf %58, %60 : vector<64x1xf32>
    %c0_42 = arith.constant 0 : index
    %c0_43 = arith.constant 0 : index
    %62 = vector.load %arg15[%c0_42, %c0_43] : memref<64x1xf32, #tpu.memory_space<vmem>>, vector<64x1xf32>
    %63 = arith.addf %61, %62 : vector<64x1xf32>
    %64 = math.tanh %63 : vector<64x1xf32>
    %65 = arith.mulf %56, %1 : vector<64x1xf32>
    %66 = arith.mulf %44, %64 : vector<64x1xf32>
    %67 = arith.addf %65, %66 : vector<64x1xf32>
    %c0_44 = arith.constant 0 : index
    %c0_45 = arith.constant 0 : index
    %68 = vector.load %arg3[%c0_44, %c0_45] : memref<32x64xf32, #tpu.memory_space<vmem>>, vector<32x64xf32>
    %cst_46 = arith.constant dense<0.000000e+00> : vector<32x1xf32>
    %69 = tpu.matmul %68, %67, %cst_46 {dimension_numbers = #tpu.dot_dimension_numbers<[1], [0], [0], [1], [0, 0, 1, 1], [], []>} : vector<32x64xf32>, vector<64x1xf32>, vector<32x1xf32> -> vector<32x1xf32>
    %70 = vector.broadcast %69 : vector<32x1xf32> to vector<32x8xf32>
    %71 = arith.addf %8, %70 : vector<32x8xf32>
    %72 = math.tanh %71 : vector<32x8xf32>
    %73 = vector.broadcast %9 : vector<32x1xf32> to vector<32x8xf32>
    %74 = arith.mulf %72, %73 : vector<32x8xf32>
    %cst_47 = arith.constant dense<0.000000e+00> : vector<8xf32>
    %75 = vector.multi_reduction <add>, %74, %cst_47 [0] : vector<32x8xf32> to vector<8xf32>
    %76 = vector.shape_cast %75 : vector<8xf32> to vector<1x8xf32>
    %cst_48 = arith.constant dense<0xFF800000> : vector<1xf32>
    %77 = vector.multi_reduction <maximumf>, %76, %cst_48 [1] : vector<1x8xf32> to vector<1xf32>
    %78 = vector.shape_cast %77 : vector<1xf32> to vector<1x1xf32>
    %79 = vector.broadcast %78 : vector<1x1xf32> to vector<1x8xf32>
    %80 = arith.subf %76, %79 : vector<1x8xf32>
    %81 = math.exp %80 : vector<1x8xf32>
    %cst_49 = arith.constant dense<0.000000e+00> : vector<1xf32>
    %82 = vector.multi_reduction <add>, %81, %cst_49 [1] : vector<1x8xf32> to vector<1xf32>
    %83 = vector.shape_cast %82 : vector<1xf32> to vector<1x1xf32>
    %84 = tpu.reciprocal %83 : vector<1x1xf32> -> vector<1x1xf32>
    %85 = vector.broadcast %84 : vector<1x1xf32> to vector<1x8xf32>
    %86 = arith.mulf %81, %85 : vector<1x8xf32>
    %87 = tpu.concatenate %28, %86 in 0 : vector<1x8xf32>, vector<1x8xf32> -> vector<2x8xf32>
    %c0_50 = arith.constant 0 : index
    %c0_51 = arith.constant 0 : index
    %c0_52 = arith.constant 0 : index
    %88 = vector.load %arg16[%c0_50, %c0_51, %c0_52] : memref<1x2x8xf32, #tpu.memory_space<vmem>>, vector<1x2x8xf32>
    %89 = vector.shape_cast %88 : vector<1x2x8xf32> to vector<2x8xf32>
    %90 = vector.shape_cast %87 : vector<2x8xf32> to vector<1x2x8xf32>
    tpu.vector_store %arg16[%c0_50, %c0_51, %c0_52], %90 {strides = array<i32>} : memref<1x2x8xf32, #tpu.memory_space<vmem>>, vector<1x2x8xf32>,
    return
  }
  func.func @transform_0(%arg0: i32) -> (i32, i32, i32) {
    %c0_i32 = arith.constant 0 : i32
    %c0_i32_0 = arith.constant 0 : i32
    %c0_i32_1 = arith.constant 0 : i32
    return %arg0, %c0_i32, %c0_i32_0 : i32, i32, i32
  }
  func.func @transform_1(%arg0: i32) -> (i32, i32, i32) {
    %c0_i32 = arith.constant 0 : i32
    %c0_i32_0 = arith.constant 0 : i32
    %c0_i32_1 = arith.constant 0 : i32
    return %arg0, %c0_i32, %c0_i32_0 : i32, i32, i32
  }
  func.func @transform_2(%arg0: i32) -> (i32, i32) {
    %c0_i32 = arith.constant 0 : i32
    %c0_i32_0 = arith.constant 0 : i32
    %c0_i32_1 = arith.constant 0 : i32
    return %c0_i32, %c0_i32_0 : i32, i32
  }
  func.func @transform_3(%arg0: i32) -> (i32, i32) {
    %c0_i32 = arith.constant 0 : i32
    %c0_i32_0 = arith.constant 0 : i32
    %c0_i32_1 = arith.constant 0 : i32
    return %c0_i32, %c0_i32_0 : i32, i32
  }
  func.func @transform_4(%arg0: i32) -> (i32, i32) {
    %c0_i32 = arith.constant 0 : i32
    %c0_i32_0 = arith.constant 0 : i32
    %c0_i32_1 = arith.constant 0 : i32
    return %c0_i32, %c0_i32_0 : i32, i32
  }
  func.func @transform_5(%arg0: i32) -> (i32, i32) {
    %c0_i32 = arith.constant 0 : i32
    %c0_i32_0 = arith.constant 0 : i32
    %c0_i32_1 = arith.constant 0 : i32
    return %c0_i32, %c0_i32_0 : i32, i32
  }
  func.func @transform_6(%arg0: i32) -> (i32, i32) {
    %c0_i32 = arith.constant 0 : i32
    %c0_i32_0 = arith.constant 0 : i32
    %c0_i32_1 = arith.constant 0 : i32
    return %c0_i32, %c0_i32_0 : i32, i32
  }
  func.func @transform_7(%arg0: i32) -> (i32, i32) {
    %c0_i32 = arith.constant 0 : i32
    %c0_i32_0 = arith.constant 0 : i32
    %c0_i32_1 = arith.constant 0 : i32
    return %c0_i32, %c0_i32_0 : i32, i32
  }
  func.func @transform_8(%arg0: i32) -> (i32, i32) {
    %c0_i32 = arith.constant 0 : i32
    %c0_i32_0 = arith.constant 0 : i32
    %c0_i32_1 = arith.constant 0 : i32
    return %c0_i32, %c0_i32_0 : i32, i32
  }
  func.func @transform_9(%arg0: i32) -> (i32, i32) {
    %c0_i32 = arith.constant 0 : i32
    %c0_i32_0 = arith.constant 0 : i32
    %c0_i32_1 = arith.constant 0 : i32
    return %c0_i32, %c0_i32_0 : i32, i32
  }
  func.func @transform_10(%arg0: i32) -> (i32, i32) {
    %c0_i32 = arith.constant 0 : i32
    %c0_i32_0 = arith.constant 0 : i32
    %c0_i32_1 = arith.constant 0 : i32
    return %c0_i32, %c0_i32_0 : i32, i32
  }
  func.func @transform_11(%arg0: i32) -> (i32, i32) {
    %c0_i32 = arith.constant 0 : i32
    %c0_i32_0 = arith.constant 0 : i32
    %c0_i32_1 = arith.constant 0 : i32
    return %c0_i32, %c0_i32_0 : i32, i32
  }
  func.func @transform_12(%arg0: i32) -> (i32, i32) {
    %c0_i32 = arith.constant 0 : i32
    %c0_i32_0 = arith.constant 0 : i32
    %c0_i32_1 = arith.constant 0 : i32
    return %c0_i32, %c0_i32_0 : i32, i32
  }
  func.func @transform_13(%arg0: i32) -> (i32, i32) {
    %c0_i32 = arith.constant 0 : i32
    %c0_i32_0 = arith.constant 0 : i32
    %c0_i32_1 = arith.constant 0 : i32
    return %c0_i32, %c0_i32_0 : i32, i32
  }
  func.func @transform_14(%arg0: i32) -> (i32, i32) {
    %c0_i32 = arith.constant 0 : i32
    %c0_i32_0 = arith.constant 0 : i32
    %c0_i32_1 = arith.constant 0 : i32
    return %c0_i32, %c0_i32_0 : i32, i32
  }
  func.func @transform_15(%arg0: i32) -> (i32, i32, i32) {
    %c0_i32 = arith.constant 0 : i32
    %c0_i32_0 = arith.constant 0 : i32
    %c0_i32_1 = arith.constant 0 : i32
    return %arg0, %c0_i32, %c0_i32_0 : i32, i32, i32
  }
}

</mosaic_0001>

<bundles_post_ra>
// kernel: tpu_custom_call.1
= control target key start
LH: loop header
LB: loop body
LE: loop exit
PB: predicated region body
PF: predicated region fallthrough
CT: control target
= control target key end

     0   :  { %20 = vsyncpa [#allocation3], 0  ;;  %s3600_s0 = inlined_call_operand.vmem [shape: f32[2,64,1], index: 0, kind: input, shape index: {}]   ;;  %s3601_s1 = inlined_call_operand.vmem [shape: f32[2,64,8], index: 1, kind: input, shape index: {}]   ;;  %s3602_s2 = inlined_call_operand.vmem [shape: f32[32,64], index: 2, kind: input, shape index: {}]   ;;  %s3603_s3 = inlined_call_operand.vmem [shape: f32[32,64], index: 3, kind: input, shape index: {}]   ;;  %s3604_s4 = inlined_call_operand.vmem [shape: f32[32,1], index: 4, kind: input, shape index: {}]   ;;  %s3605_s5 = inlined_call_operand.vmem [shape: f32[32,1], index: 5, kind: input, shape index: {}]   ;;  %s3606_s6 = inlined_call_operand.vmem [shape: f32[64,64], index: 6, kind: input, shape index: {}]   ;;  %s3607_s7 = inlined_call_operand.vmem [shape: f32[64,64], index: 7, kind: input, shape index: {}]   ;;  %s3608_s8 = inlined_call_operand.vmem [shape: f32[64,64], index: 8, kind: input, shape index: {}]   ;;  %s3609_s9 = inlined_call_operand.vmem [shape: f32[64,64], index: 9, kind: input, shape index: {}]   ;;  %s3610_s10 = inlined_call_operand.vmem [shape: f32[64,64], index: 10, kind: input, shape index: {}]   ;;  %s3611_s11 = inlined_call_operand.vmem [shape: f32[64,64], index: 11, kind: input, shape index: {}]   ;;  %s3612_s12 = inlined_call_operand.vmem [shape: f32[64,1], index: 12, kind: input, shape index: {}]   ;;  %s3613_s13 = inlined_call_operand.vmem [shape: f32[64,1], index: 13, kind: input, shape index: {}]   ;;  %s3614_s14 = inlined_call_operand.vmem [shape: f32[64,1], index: 14, kind: input, shape index: {}]   ;;  %s3615_s15 = inlined_call_operand.hbm [shape: f32[2,2,8], index: 15, kind: output, shape index: {}]  }
   0x1   :  { %22 = vsyncpa [#allocation3 + $0x1], 0  ;;  %s2870_s18 = smov 0   ;;  %s2872_s19 = smov 0  }
   0x2   :  { %s2874_s20 = smov 0   ;;  %s2876_s21 = smov 0  }
   0x3 LB: > { %3622 = sst [smem:[#allocation5_spill]] %s2774_s18  ;;  %s2891_s22 = sadd.s32 4294967295, %s2786_s21   ;;  %s2786_s21 = sphi %s2876_s21, %s3633_s21   ;;  %s2782_s20 = sphi %s2874_s20, %s3635_s20   ;;  %s2778_s19 = sphi %s2872_s19, %s3637_s19   ;;  %s2774_s18 = sphi %s2870_s18, %s3636_s18  }
   0x4   : > { %3623 = sst [smem:[#allocation6_spill]] %s2782_s20  ;;  %s2097_s23 = sadd.s32 4294967294, %s2786_s21  }
   0x5   : > { %3624 = sst [smem:[#allocation7_spill]] %s2786_s21  ;;  %s2895_s24 = sadd.s32 1, %s2786_s21  }
   0x6   : > { %3625 = sst [smem:[#allocation8_spill]] %s2895_s24  ;;  %s360_s25 = sadd.s32 1, %s2782_s20 }
   0x7   : > { %s357_s26 = ssub.s32 %s2786_s21, %s2895_s24  ;;  %p370_p0 = scmp.ne.s32.totalorder %s2782_s20, %s2778_s19 }
   0x8   : > { %p358_p1 = scmp.eq.s32.totalorder %s357_s26, 0  ;;  %p371_p2 = scmp.eq.s32.totalorder %s2891_s22, 1 }
   0x9   : > { %p376_p3 = scmp.ne.s32.totalorder %s2778_s19, %s2774_s18  ;;  %p377_p4 = scmp.eq.s32.totalorder %s2097_s23, 1 }
   0xa   : > { %s2906_s27 = scalar_select %p358_p1, %s2782_s20, %s360_s25  }
   0xb   : > { %p2908_p5 = por %p371_p2, %p370_p0  ;;  %p2912_p6 = por %p377_p4, %p376_p3 }
   0xc   : > { %3626 = sst [smem:[#allocation9_spill]] %s2906_s27  ;;  %p2100_p7 = scmp.ge.s32.totalorder %s2786_s21, 1 }
   0xd   : > { %s3628_s29 = scalar_select %p2912_p6, 1, 0 }
   0xe   : > { %p450_p8 = scmp.lt.s32.totalorder %s2786_s21, 3 }
   0xf   : > { %3629 = sst [smem:[#allocation10_spill]] %s3628_s29 }
  0x10   : > { %p451_p9 = pnand %p2100_p7, %p450_p8 }
  0x11   : > { %p503_p10 = scmp.lt.s32.totalorder (!%p451_p9), %s2891_s22, 1  ;;  %s500_s24 = sand.u32 (!%p451_p9), 1, %s2778_s19  }
  0x12   : > { %454 = sbr.rel (%p451_p9) target bundleno = 1838 (0x72e), region = 80  ;;  %s2101_s29 = sshll.u32 (!%p451_p9), %s500_s24, 1 }
  0x13   : > { %s2183_s16 = sshll.u32 (!%p451_p9), %s2891_s22, 5  ;;  %s502_s17 = scalar_lea.vmem (!%p451_p9), [#allocation2], %s2101_s29 }
  0x14   : > { %s2026_s23 = sshll.u32 (!%p451_p9), %s502_s17, 4  ;;  %s2027_s23 = int_to_ptr.vmem [resolvable:$true] %s2026_s23 }
  0x15   : > { %s2726_s30 = scalar_lea.vmem (!%p451_p9), %s2027_s23, 32 }
  0x16   : > { %p2727_p11 = scmp.ne.s32.totalorder (!%p451_p9), %s2027_s23, %s2726_s30 }
  0x17   : > { %vm557_vm0 = vcmask 523264   ;;  %v2922_v0 = vld [vmem:[%s3602_s2] sm:$0xff]  ;;  %v2788_v2 = vmov 0   ;;  %s504_s25 = scalar_select %p503_p10, %s2891_s22, 1  ;;  %v535_v4 = vld [vmem:[%s3604_s4 + $0x10] sm:$0xff]  ;;  %v534_v5 = vld [vmem:[%s3604_s4 + $0x8] sm:$0xff] }
  0x18   : > { %2358 = vmatprep.mubr.msk.f32.mxu1 %vm557_vm0, %v2922_v0  ;;  %v529_v1 = vld [vmem:[%s3603_s3] sm:$0xff]  ;;  %2610 = vset.pattern.permute.xlu0 %v2788_v2  ;;  %v536_v6 = vld [vmem:[%s3604_s4 + $0x18] sm:$0xff]  ;;  %v660_v22 = vld [vmem:[%s3602_s2 + $0x8] sm:$0xff]  ;;  %vm812_vm1 = vcmask 64512   ;;  %vm2008_vm2 = vcmask 1040384   ;;  %vm2010_vm3 = vcmask 58368   ;;  %p2728_p12 = pnand %p2727_p11, %p2908_p5 }
  0x19   : > { %2336 = vmatprep.mubr.msk.f32.mxu0 %vm557_vm0, %v529_v1  ;;  %v533_v3 = vld [vmem:[%s3604_s4] sm:$0xff]  ;;  %2611 = vset.pattern.permute.xlu1 %v2788_v2  ;;  %s2186_s20 = sshll.u32 %s504_s25, 6  ;;  %v3034_v24 = vld [vmem:[%s3602_s2 + $0x10] sm:$0xff]  ;;  %v530_v25 = vld [vmem:[%s3603_s3 + $0x8] sm:$0xff]  ;;  %s3564_s25 = scalar_lea.hbm %s3615_s15, %s2183_s16 }
  0x1a   : > { %539 = vperm.xlu0 %2610, %v533_v3   ;;  %549 = vperm.xlu1 %2611, %v535_v4   ;;  %s2943_s18 = scalar_lea.vmem %s3600_s0, %s2186_s20  ;;  %s2948_s26 = scalar_lea.vmem %s3601_s1, %s2186_s20  ;;  %v531_v26 = vld [vmem:[%s3603_s3 + $0x10] sm:$0xff]  ;;  %v662_v27 = vld [vmem:[%s3602_s2 + $0x18] sm:$0xff]  ;;  %v656_v33 = vld [vmem:[%s3605_s5 + $0x8] sm:$0xff] }
  0x1b   : > { %v2954_v7 = vld [vmem:[%s2943_s18 + $0x38] sm:$0xff]  ;;  %v2957_v8 = vld [vmem:[%s2943_s18 + $0x30] sm:$0xff]  ;;  %v2962_v9 = vld [vmem:[%s2943_s18 + $0x28] sm:$0xff]  ;;  %p2729_p13 = pneg %p2728_p12  ;;  %s2789_s22 = smov [#allocation2]  }
  0x1c   : > { %2342 = vmatprep.subr.mxu1 %v2954_v7  ;;  %v2965_v10 = vld [vmem:[%s2948_s26 + $0x38] sm:$0xff]  ;;  %v2970_v11 = vld [vmem:[%s2948_s26 + $0x30] sm:$0xff]  ;;  %v2974_v12 = vld [vmem:[%s2943_s18 + $0x20] sm:$0xff]  ;;  %s2730_s20 = sshll.u32 %s2789_s22, 4  ;;  %s2731_s20 = int_to_ptr.vmem [resolvable:$false] %s2730_s20 }
  0x1d   : > { %2343 = vmatpush3.msra.mxu1 %v2954_v7  ;;  %2320 = vmatprep.subr.mxu0 %v2965_v10  ;;  %v2978_v13 = vld [vmem:[%s2948_s26 + $0x28] sm:$0xff]  ;;  %v2984_v14 = vld [vmem:[%s2943_s18 + $0x18] sm:$0xff]  ;;  %v2988_v15 = vld [vmem:[%s2948_s26 + $0x20] sm:$0xff]  ;;  %s2732_s21 = scalar_lea.vmem %s2731_s20, 64  ;;  %p2733_p0 = scmp.lt.s32.totalorder %s2027_s23, %s2731_s20 }
  0x1e   : > { %544 = vperm.xlu0 %2610, %v534_v5   ;;  %554 = vperm.xlu1 %2611, %v536_v6   ;;  %v2994_v16 = vld [vmem:[%s2943_s18 + $0x10] sm:$0xff]  ;;  %v2998_v17 = vld [vmem:[%s2948_s26 + $0x18] sm:$0xff]  ;;  %v3004_v18 = vld [vmem:[%s2943_s18 + $0x8] sm:$0xff]  ;;  %p2734_p1 = scmp.lt.s32.totalorder %s2732_s21, %s2726_s30 }
  0x1f   : > { %2344 = vmatprep.subr.mxu1 %v2957_v8  ;;  %2321 = vmatpush3.msra.mxu0 %v2965_v10  ;;  %v3008_v19 = vld [vmem:[%s2948_s26 + $0x10] sm:$0xff]  ;;  %v3014_v20 = vld [vmem:[%s2943_s18] sm:$0xff]  ;;  %v3018_v21 = vld [vmem:[%s2948_s26 + $0x8] sm:$0xff] }
  0x20   : > { %2345 = vmatpush3.msra.mxu1 %v2957_v8  ;;  %2322 = vmatprep.subr.mxu0 %v2970_v11  ;;  %v3028_v23 = vld [vmem:[%s2948_s26] sm:$0xff]  ;;  %v532_v28 = vld [vmem:[%s3603_s3 + $0x18] sm:$0xff]  ;;  %v657_v36 = vld [vmem:[%s3605_s5 + $0x10] sm:$0xff]  ;;  %p2735_p2 = por %p2734_p1, %p2733_p0 }
  0x21   : > { %2346 = vmatprep.subr.mxu1 %v2962_v9  ;;  %2323 = vmatpush3.msra.mxu0 %v2970_v11  ;;  %v655_v34 = vld [vmem:[%s3605_s5] sm:$0xff]  ;;  %v658_v35 = vld [vmem:[%s3605_s5 + $0x18] sm:$0xff] }
  0x22   : > { %2347 = vmatpush3.msra.mxu1 %v2962_v9  ;;  %2324 = vmatprep.subr.mxu0 %v2978_v13  ;;  %p2736_p3 = pnand %p2735_p2, %p2729_p13 }
  0x23   : > { %2348 = vmatprep.subr.mxu1 %v2974_v12  ;;  %2325 = vmatpush3.msra.mxu0 %v2978_v13 }
  0x24   : > { %2349 = vmatpush3.msra.mxu1 %v2974_v12  ;;  %2326 = vmatprep.subr.mxu0 %v2988_v15 }
  0x25   : > { %2350 = vmatprep.subr.mxu1 %v2984_v14  ;;  %2327 = vmatpush3.msra.mxu0 %v2988_v15 }
  0x26   : > { %2351 = vmatpush3.msra.mxu1 %v2984_v14  ;;  %2328 = vmatprep.subr.mxu0 %v2998_v17 }
  0x27   : > { %2352 = vmatprep.subr.mxu1 %v2994_v16  ;;  %2329 = vmatpush3.msra.mxu0 %v2998_v17 }
  0x28   : > { %2353 = vmatpush3.msra.mxu1 %v2994_v16  ;;  %2330 = vmatprep.subr.mxu0 %v3008_v19 }
  0x29   : > { %2354 = vmatprep.subr.mxu1 %v3004_v18  ;;  %2331 = vmatpush3.msra.mxu0 %v3008_v19 }
  0x2a   : > { %2355 = vmatpush3.msra.mxu1 %v3004_v18  ;;  %2332 = vmatprep.subr.mxu0 %v3018_v21 }
  0x2b   : > { %2356 = vmatprep.subr.mxu1 %v3014_v20  ;;  %2333 = vmatpush3.msra.mxu0 %v3018_v21 }
  0x2c   : > { %2357 = vmatpush3.msra.mxu1 %v3014_v20  ;;  %2334 = vmatprep.subr.mxu0 %v3028_v23 }
  0x2d   : > { %2359 = vmatmul.mubr.msk.f32.vlgmr.msra.gmra.mxu1 %vm557_vm0, %v660_v22  ;;  %2335 = vmatpush3.msra.mxu0 %v3028_v23 }
  0x2e   : > { %2361 = vmatprep.mubr.msk.f32.mxu1 %vm557_vm0, %v3034_v24  ;;  %2337 = vmatmul.mubr.msk.f32.vlgmr.msra.gmra.mxu0 %vm557_vm0, %v530_v25 }
  0x2f   : > { %2392 = vmatprep.subr.mxu1 %v2954_v7  ;;  %2339 = vmatprep.mubr.msk.f32.mxu0 %vm557_vm0, %v531_v26 }
  0x30   : > { %2393 = vmatpush3.msra.mxu1 %v2954_v7 }
  0x31   : > { %2362 = vmatmul.mubr.msk.f32.gmra.mxu1 %vm557_vm0, %v662_v27  ;;  %2394 = vmatprep.subr.mxu1 %v2957_v8 }
  0x32   : > { %2395 = vmatpush3.msra.mxu1 %v2957_v8  ;;  %2340 = vmatmul.mubr.msk.f32.gmra.mxu0 %vm557_vm0, %v532_v28 }
  0x33   : > { %2396 = vmatprep.subr.mxu1 %v2962_v9 }
  0x34   : > { %2397 = vmatpush3.msra.mxu1 %v2962_v9 }
  0x35   : > { %2398 = vmatprep.subr.mxu1 %v2974_v12 }
  0x36   : > { %2399 = vmatpush3.msra.mxu1 %v2974_v12 }
  0x37   : > { %2400 = vmatprep.subr.mxu1 %v2984_v14 }
  0x38   : > { %2401 = vmatpush3.msra.mxu1 %v2984_v14 }
  0x39   : > { %2402 = vmatprep.subr.mxu1 %v2994_v16 }
  0x3a   : > { %2403 = vmatpush3.msra.mxu1 %v2994_v16 }
  0x3b   : > { %2404 = vmatprep.subr.mxu1 %v3004_v18 }
  0x3c   : > { %2405 = vmatpush3.msra.mxu1 %v3004_v18 }
  0x3d   : > { %2406 = vmatprep.subr.mxu1 %v3014_v20 }
  0x3e   : > { %2407 = vmatpush3.msra.mxu1 %v3014_v20 }
  0x3f   : > { %2448 = vmatprep.subr.mxu1 %v2954_v7 }
  0x95   : > { %v540_v37 = vpop.permute.xlu0 %539  ;;  %v550_v39 = vpop.permute.xlu1 %549 }
  0x99   : > { %v545_v41 = vpop.permute.xlu0 %544  ;;  %v555_v43 = vpop.permute.xlu1 %554 }
  0xed   : > { %v2360_v29 = vpop.f32.mrf.mxu1 }
  0xee   : > { %767 = vperm.xlu0 %2610, %v2360_v29   ;;  %v2338_v38 = vpop.f32.mrf.mxu0 }
  0xef   : > { %v741_v30 = vpop.f32.mrf.mxu1  ;;  %v3089_v44 = vadd.f32 %v2338_v38, %v545_v41 }
  0xf0   : > { %762 = vperm.xlu1 %2611, %v741_v30   ;;  %v636_v40 = vpop.f32.mrf.mxu0 }
  0xf1   : > { %v2363_v31 = vpop.f32.mrf.mxu1  ;;  %v3091_v46 = vadd.f32 %v636_v40, %v540_v37 }
  0xf2   : > { %v2341_v42 = vpop.f32.mrf.mxu0 }
  0xf3   : > { %v751_v32 = vpop.f32.mrf.mxu1  ;;  %v3095_v51 = vadd.f32 %v2341_v42, %v555_v43 }
  0xf4   : > { %777 = vperm.xlu1 %2611, %v2363_v31   ;;  %772 = vperm.xlu0 %2610, %v751_v32   ;;  %v646_v48 = vpop.f32.mrf.mxu0 }
  0xf5   : > { %v3097_v52 = vadd.f32 %v646_v48, %v550_v39 }
  0xf8   : > { %795 = vperm.xlu1 %2611, %v656_v33   ;;  %790 = vperm.xlu0 %2610, %v655_v34  }
  0xfc   : > { %805 = vperm.xlu1 %2611, %v658_v35   ;;  %800 = vperm.xlu0 %2610, %v657_v36  }
 0x169   : > { %v768_v45 = vpop.permute.xlu0 %767 }
 0x16a   : > { %v781_v47 = vadd.f32 %v768_v45, %v3089_v44 }
 0x16b   : > { %v763_v49 = vpop.permute.xlu1 %762 }
 0x16c   : > { %v780_v50 = vadd.f32 %v763_v49, %v3091_v46  ;;  %2612 = vtanh.f32 %v781_v47 }
 0x16e   : > { %2614 = vtanh.f32 %v780_v50 }
 0x16f   : > { %v778_v53 = vpop.permute.xlu1 %777  ;;  %v773_v54 = vpop.permute.xlu0 %772 }
 0x170   : > { %v783_v55 = vadd.f32 %v778_v53, %v3095_v51  ;;  %v782_v56 = vadd.f32 %v773_v54, %v3097_v52 }
 0x172   : > { %2616 = vtanh.f32 %v783_v55 }
 0x173   : > { %2618 = vtanh.f32 %v782_v56  ;;  %v3101_v58 = vpop.permute.xlu1 %795  ;;  %v3103_v59 = vpop.permute.xlu0 %790 }
 0x177   : > { %v3108_v3 = vpop.permute.xlu1 %805  ;;  %v3110_v4 = vpop.permute.xlu0 %800 }
 0x179   : > { %v2613_v57 = vpop.eup %2612 }
 0x17a   : > { %v809_v62 = vmul.f32 %v2613_v57, %v3101_v58 }
 0x17b   : > { %v2615_v60 = vpop.eup %2614 }
 0x17c   : > { %v808_v61 = vmul.f32 %v2615_v60, %v3103_v59  ;;  %v814_v5 = vsel %vm812_vm1, %v809_v62, 0.0  ;;  %v871_v62 = vld [vmem:[%s3606_s6 + $0x10] sm:$0xff] }
 0x17e   : > { %v813_v1 = vsel %vm812_vm1, %v808_v61, 0.0 }
 0x17f   : > { %v2617_v63 = vpop.eup %2616  ;;  %v815_v25 = vadd.f32 %v814_v5, %v813_v1  ;;  %v873_v1 = vld [vmem:[%s3606_s6 + $0x20] sm:$0xff]  ;;  %v875_v5 = vld [vmem:[%s3606_s6 + $0x30] sm:$0xff] }
 0x180   : > { %v2619_v2 = vpop.eup %2618  ;;  %v811_v6 = vmul.f32 %v2617_v63, %v3108_v3  ;;  %v872_v63 = vld [vmem:[%s3606_s6 + $0x18] sm:$0xff] }
 0x181   : > { %v810_v22 = vmul.f32 %v2619_v2, %v3110_v4  ;;  %v874_v2 = vld [vmem:[%s3606_s6 + $0x28] sm:$0xff] }
 0x182   : > { %v818_v28 = vsel %vm812_vm1, %v811_v6, 0.0  ;;  %v876_v6 = vld [vmem:[%s3606_s6 + $0x38] sm:$0xff] }
 0x183   : > { %v816_v26 = vsel %vm812_vm1, %v810_v22, 0.0  ;;  %v1207_v22 = vld [vmem:[%s3607_s7] sm:$0xff] }
 0x184   : > { %v817_v27 = vadd.f32 %v816_v26, %v815_v25  ;;  %v1208_v25 = vld [vmem:[%s3607_s7 + $0x8] sm:$0xff]  ;;  %v1209_v26 = vld [vmem:[%s3607_s7 + $0x10] sm:$0xff] }
 0x186   : > { %v819_v29 = vadd.f32 %v818_v28, %v817_v27  ;;  %v1210_v27 = vld [vmem:[%s3607_s7 + $0x18] sm:$0xff]  ;;  %v1211_v28 = vld [vmem:[%s3607_s7 + $0x20] sm:$0xff] }
 0x188   : > { %v820_v30 = vrot.slane %v819_v29, 4 }
 0x18a   : > { %v821_v31 = vadd.f32 %v820_v30, %v819_v29  ;;  %v1550_v29 = vld [vmem:[%s3608_s8 + $0x28] sm:$0xff]  ;;  %v1551_v30 = vld [vmem:[%s3608_s8 + $0x30] sm:$0xff] }
 0x18c   : > { %v822_v32 = vrot.slane %v821_v31, 2 }
 0x18e   : > { %v823_v33 = vadd.f32 %v822_v32, %v821_v31  ;;  %v1552_v31 = vld [vmem:[%s3608_s8 + $0x38] sm:$0xff] }
 0x190   : > { %v824_v34 = vrot.slane %v823_v33, 1 }
 0x192   : > { %v825_v35 = vadd.f32 %v824_v34, %v823_v33 }
 0x194   : > { %v826_v36 = vsel %vm812_vm1, %v825_v35, -inf }
 0x195   : > { %827 = vmax.xlane.f32.xlu0 %v826_v36 }
 0x21e   : > { %v828_v37 = vpop.xlane.xlu0 %827 }
 0x21f   : > { %v829_v38 = vsub.f32 %v825_v35, %v828_v37 }
 0x221   : > { %v830_v39 = vmul.f32 1.442695, %v829_v38 }
 0x223   : > { %2620 = vpow2.f32 %v830_v39  ;;  %v878_v39 = vld [vmem:[%s3609_s9 + $0x8] sm:$0xff] }
 0x230   : > { %v2621_v40 = vpop.eup %2620 }
 0x231   : > { %v832_v41 = vsel %vm812_vm1, %v2621_v40, 0.0 }
 0x232   : > { %833 = vadd.xlane.f32.xlu1 %v832_v41  ;;  %v880_v41 = vld [vmem:[%s3609_s9 + $0x18] sm:$0xff] }
 0x2bb   : > { %v834_v42 = vpop.xlane.xlu1 %833 }
 0x2bc   : > { %2622 = vrcp.f32 %v834_v42  ;;  %v881_v42 = vld [vmem:[%s3609_s9 + $0x20] sm:$0xff] }
 0x2c9   : > { %v2623_v43 = vpop.eup %2622 }
 0x2ca   : > { %v3119_v45 = vmul.f32 %v2623_v43, %v2621_v40  ;;  %v879_v40 = vld [vmem:[%s3609_s9 + $0x10] sm:$0xff]  ;;  %v882_v43 = vld [vmem:[%s3609_s9 + $0x28] sm:$0xff] }
 0x2cc   : > { %v844_v47 = vmul.f32 %v3119_v45, %v2965_v10  ;;  %v842_v48 = vmul.f32 %v3119_v45, %v2978_v13  ;;  %v843_v53 = vmul.f32 %v3119_v45, %v2970_v11  ;;  %v840_v54 = vmul.f32 %v3119_v45, %v2998_v17 }
 0x2cd   : > { %v841_v10 = vmul.f32 %v3119_v45, %v2988_v15  ;;  %v838_v13 = vmul.f32 %v3119_v45, %v3018_v21  ;;  %v839_v17 = vmul.f32 %v3119_v45, %v3008_v19  ;;  %v837_v61 = vmul.f32 %v3119_v45, %v3028_v23  ;;  %v869_v21 = vld [vmem:[%s3606_s6] sm:$0xff]  ;;  %v870_v19 = vld [vmem:[%s3606_s6 + $0x8] sm:$0xff] }
 0x2ce   : > { %v866_v49 = vsel %vm812_vm1, %v844_v47, 0.0  ;;  %v860_v50 = vsel %vm812_vm1, %v842_v48, 0.0  ;;  %v863_v55 = vsel %vm812_vm1, %v843_v53, 0.0  ;;  %v854_v56 = vsel %vm812_vm1, %v840_v54, 0.0  ;;  %2408 = vmatprep.mubr.msk.f32.mxu1 %vm557_vm0, %v869_v21  ;;  %v877_v23 = vld [vmem:[%s3609_s9] sm:$0xff]  ;;  %v883_v47 = vld [vmem:[%s3609_s9 + $0x30] sm:$0xff] }
 0x2cf   : > { %867 = vadd.xlane.f32.xlu0 %v866_v49  ;;  %861 = vadd.xlane.f32.xlu1 %v860_v50  ;;  %v857_v57 = vsel %vm812_vm1, %v841_v10, 0.0  ;;  %v848_v11 = vsel %vm812_vm1, %v838_v13, 0.0  ;;  %v851_v60 = vsel %vm812_vm1, %v839_v17, 0.0  ;;  %v845_v15 = vsel %vm812_vm1, %v837_v61, 0.0  ;;  %v884_v48 = vld [vmem:[%s3609_s9 + $0x38] sm:$0xff]  ;;  %v1215_v49 = vld [vmem:[%s3610_s10] sm:$0xff] }
 0x2d0   : > { %2409 = vmatmul.mubr.msk.f32.vlgmr.msra.gmra.mxu1 %vm557_vm0, %v870_v19  ;;  %2380 = vmatprep.mubr.msk.f32.mxu0 %vm557_vm0, %v877_v23  ;;  %v1216_v50 = vld [vmem:[%s3610_s10 + $0x8] sm:$0xff]  ;;  %v1217_v53 = vld [vmem:[%s3610_s10 + $0x10] sm:$0xff]  ;;  %v1218_v54 = vld [vmem:[%s3610_s10 + $0x18] sm:$0xff] }
 0x2d1   : > { %2449 = vmatpush3.msra.mxu1 %v2954_v7  ;;  %2411 = vmatprep.mubr.msk.f32.mxu1 %vm557_vm0, %v871_v62  ;;  %v1221_v10 = vld [vmem:[%s3610_s10 + $0x30] sm:$0xff]  ;;  %v1222_v13 = vld [vmem:[%s3610_s10 + $0x38] sm:$0xff]  ;;  %v1557_v61 = vld [vmem:[%s3611_s11 + $0x20] sm:$0xff] }
 0x2d2   : > { %2450 = vmatprep.subr.mxu1 %v2957_v8  ;;  %v1555_v17 = vld [vmem:[%s3611_s11 + $0x10] sm:$0xff]  ;;  %v1560_v19 = vld [vmem:[%s3611_s11 + $0x38] sm:$0xff] }
 0x2d3   : > { %864 = vadd.xlane.f32.xlu0 %v863_v55  ;;  %855 = vadd.xlane.f32.xlu1 %v854_v56  ;;  %v1219_v55 = vld [vmem:[%s3610_s10 + $0x20] sm:$0xff]  ;;  %v1220_v56 = vld [vmem:[%s3610_s10 + $0x28] sm:$0xff]  ;;  %v1559_v21 = vld [vmem:[%s3611_s11 + $0x30] sm:$0xff] }
 0x2d4   : > { %2451 = vmatpush3.msra.mxu1 %v2957_v8 }
 0x2d5   : > { %2412 = vmatmul.mubr.msk.f32.gmra.mxu1 %vm557_vm0, %v872_v63  ;;  %2452 = vmatprep.subr.mxu1 %v2962_v9 }
 0x2d6   : > { %2453 = vmatpush3.msra.mxu1 %v2962_v9  ;;  %2414 = vmatprep.mubr.msk.f32.mxu1 %vm557_vm0, %v873_v1 }
 0x2d7   : > { %858 = vadd.xlane.f32.xlu0 %v857_v57  ;;  %849 = vadd.xlane.f32.xlu1 %v848_v11  ;;  %v1553_v57 = vld [vmem:[%s3611_s11] sm:$0xff]  ;;  %v1554_v11 = vld [vmem:[%s3611_s11 + $0x8] sm:$0xff] }
 0x2d8   : > { %2454 = vmatprep.subr.mxu1 %v2974_v12 }
 0x2d9   : > { %2455 = vmatpush3.msra.mxu1 %v2974_v12 }
 0x2da   : > { %2415 = vmatmul.mubr.msk.f32.gmra.mxu1 %vm557_vm0, %v874_v2  ;;  %2456 = vmatprep.subr.mxu1 %v2984_v14 }
 0x2db   : > { %852 = vadd.xlane.f32.xlu0 %v851_v60  ;;  %2457 = vmatpush3.msra.mxu1 %v2984_v14  ;;  %v1556_v60 = vld [vmem:[%s3611_s11 + $0x18] sm:$0xff] }
 0x2dc   : > { %2458 = vmatprep.subr.mxu1 %v2994_v16  ;;  %2417 = vmatprep.mubr.msk.f32.mxu1 %vm557_vm0, %v875_v5 }
 0x2dd   : > { %2459 = vmatpush3.msra.mxu1 %v2994_v16 }
 0x2de   : > { %2418 = vmatmul.mubr.msk.f32.gmra.mxu1 %vm557_vm0, %v876_v6  ;;  %2460 = vmatprep.subr.mxu1 %v3004_v18 }
 0x2df   : > { %846 = vadd.xlane.f32.xlu0 %v845_v15  ;;  %2461 = vmatpush3.msra.mxu1 %v3004_v18  ;;  %v1558_v15 = vld [vmem:[%s3611_s11 + $0x28] sm:$0xff] }
 0x2e0   : > { %2462 = vmatprep.subr.mxu1 %v3014_v20  ;;  %2464 = vmatprep.mubr.msk.f32.mxu1 %vm557_vm0, %v1207_v22 }
 0x2e1   : > { %2463 = vmatpush3.msra.mxu1 %v3014_v20 }
 0x2e2   : > { %2465 = vmatmul.mubr.msk.f32.vlgmr.msra.gmra.mxu1 %vm557_vm0, %v1208_v25  ;;  %2504 = vmatprep.subr.mxu1 %v2954_v7 }
 0x2e3   : > { %2505 = vmatpush3.msra.mxu1 %v2954_v7  ;;  %2467 = vmatprep.mubr.msk.f32.mxu1 %vm557_vm0, %v1209_v26  ;;  %v1212_v7 = vld [vmem:[%s3607_s7 + $0x28] sm:$0xff] }
 0x2e4   : > { %2506 = vmatprep.subr.mxu1 %v2957_v8 }
 0x2e5   : > { %2507 = vmatpush3.msra.mxu1 %v2957_v8  ;;  %v1213_v8 = vld [vmem:[%s3607_s7 + $0x30] sm:$0xff] }
 0x2e6   : > { %2468 = vmatmul.mubr.msk.f32.gmra.mxu1 %vm557_vm0, %v1210_v27  ;;  %2508 = vmatprep.subr.mxu1 %v2962_v9 }
 0x2e7   : > { %2509 = vmatpush3.msra.mxu1 %v2962_v9  ;;  %2470 = vmatprep.mubr.msk.f32.mxu1 %vm557_vm0, %v1211_v28  ;;  %v1214_v9 = vld [vmem:[%s3607_s7 + $0x38] sm:$0xff] }
 0x2e8   : > { %2510 = vmatprep.subr.mxu1 %v2974_v12 }
 0x2e9   : > { %2511 = vmatpush3.msra.mxu1 %v2974_v12  ;;  %v1545_v12 = vld [vmem:[%s3608_s8] sm:$0xff] }
 0x2ea   : > { %2471 = vmatmul.mubr.msk.f32.gmra.mxu1 %vm557_vm0, %v1212_v7  ;;  %2512 = vmatprep.subr.mxu1 %v2984_v14 }
 0x2eb   : > { %2513 = vmatpush3.msra.mxu1 %v2984_v14  ;;  %2473 = vmatprep.mubr.msk.f32.mxu1 %vm557_vm0, %v1213_v8  ;;  %v1546_v14 = vld [vmem:[%s3608_s8 + $0x8] sm:$0xff] }
 0x2ec   : > { %2514 = vmatprep.subr.mxu1 %v2994_v16 }
 0x2ed   : > { %2515 = vmatpush3.msra.mxu1 %v2994_v16  ;;  %v1547_v16 = vld [vmem:[%s3608_s8 + $0x10] sm:$0xff] }
 0x2ee   : > { %2474 = vmatmul.mubr.msk.f32.gmra.mxu1 %vm557_vm0, %v1214_v9  ;;  %2516 = vmatprep.subr.mxu1 %v3004_v18 }
 0x2ef   : > { %2517 = vmatpush3.msra.mxu1 %v3004_v18  ;;  %2520 = vmatprep.mubr.msk.f32.mxu1 %vm557_vm0, %v1545_v12  ;;  %v1548_v18 = vld [vmem:[%s3608_s8 + $0x18] sm:$0xff] }
 0x2f0   : > { %2518 = vmatprep.subr.mxu1 %v3014_v20 }
 0x2f1   : > { %2519 = vmatpush3.msra.mxu1 %v3014_v20  ;;  %v1549_v20 = vld [vmem:[%s3608_s8 + $0x20] sm:$0xff] }
 0x2f2   : > { %2521 = vmatmul.mubr.msk.f32.vlgmr.msra.gmra.mxu1 %vm557_vm0, %v1546_v14 }
 0x2f3   : > { %2523 = vmatprep.mubr.msk.f32.mxu1 %vm557_vm0, %v1547_v16 }
 0x2f6   : > { %2524 = vmatmul.mubr.msk.f32.gmra.mxu1 %vm557_vm0, %v1548_v18 }
 0x2f7   : > { %2526 = vmatprep.mubr.msk.f32.mxu1 %vm557_vm0, %v1549_v20 }
 0x2fa   : > { %2527 = vmatmul.mubr.msk.f32.gmra.mxu1 %vm557_vm0, %v1550_v29 }
 0x2fb   : > { %2529 = vmatprep.mubr.msk.f32.mxu1 %vm557_vm0, %v1551_v30  ;;  %v1146_v30 = vld [vmem:[%s3612_s12 + $0x18] sm:$0xff] }
 0x2fe   : > { %2530 = vmatmul.mubr.msk.f32.gmra.mxu1 %vm557_vm0, %v1552_v31 }
 0x2ff   : > { %2551 = vmatprep.mubr.msk.f32.mxu1 %vm557_vm0, %v3034_v24 }
 0x358   : > { %v868_v32 = vpop.xlane.xlu0 %867  ;;  %v3278_v33 = vpop.xlane.xlu1 %861 }
 0x359   : > { %2364 = vmatprep.subr.mxu0 %v868_v32 }
 0x35a   : > { %2365 = vmatpush3.msra.mxu0 %v868_v32 }
 0x35c   : > { %v865_v34 = vpop.xlane.xlu0 %864  ;;  %v3281_v35 = vpop.xlane.xlu1 %855 }
 0x35d   : > { %2366 = vmatprep.subr.mxu0 %v865_v34 }
 0x35e   : > { %2367 = vmatpush3.msra.mxu0 %v865_v34 }
 0x35f   : > { %2368 = vmatprep.subr.mxu0 %v3278_v33 }
 0x360   : > { %2369 = vmatpush3.msra.mxu0 %v3278_v33  ;;  %v859_v36 = vpop.xlane.xlu0 %858  ;;  %v3289_v37 = vpop.xlane.xlu1 %849 }
 0x361   : > { %2370 = vmatprep.subr.mxu0 %v859_v36 }
 0x362   : > { %2371 = vmatpush3.msra.mxu0 %v859_v36 }
 0x363   : > { %2372 = vmatprep.subr.mxu0 %v3281_v35 }
 0x364   : > { %2373 = vmatpush3.msra.mxu0 %v3281_v35  ;;  %v3286_v24 = vpop.xlane.xlu0 %852 }
 0x365   : > { %2374 = vmatprep.subr.mxu0 %v3286_v24 }
 0x366   : > { %2375 = vmatpush3.msra.mxu0 %v3286_v24 }
 0x367   : > { %2376 = vmatprep.subr.mxu0 %v3289_v37 }
 0x368   : > { %2377 = vmatpush3.msra.mxu0 %v3289_v37  ;;  %v3294_v38 = vpop.xlane.xlu0 %846 }
 0x369   : > { %2378 = vmatprep.subr.mxu0 %v3294_v38 }
 0x36a   : > { %2379 = vmatpush3.msra.mxu0 %v3294_v38 }
 0x36b   : > { %2381 = vmatmul.mubr.msk.f32.vlgmr.msra.gmra.mxu0 %vm557_vm0, %v878_v39  ;;  %2420 = vmatprep.subr.mxu0 %v868_v32 }
 0x36c   : > { %2421 = vmatpush3.msra.mxu0 %v868_v32  ;;  %2383 = vmatprep.mubr.msk.f32.mxu0 %vm557_vm0, %v879_v40 }
 0x36d   : > { %2422 = vmatprep.subr.mxu0 %v865_v34 }
 0x36e   : > { %2423 = vmatpush3.msra.mxu0 %v865_v34 }
 0x36f   : > { %2384 = vmatmul.mubr.msk.f32.gmra.mxu0 %vm557_vm0, %v880_v41  ;;  %2424 = vmatprep.subr.mxu0 %v3278_v33 }
 0x370   : > { %2425 = vmatpush3.msra.mxu0 %v3278_v33  ;;  %2386 = vmatprep.mubr.msk.f32.mxu0 %vm557_vm0, %v881_v42  ;;  %v1150_v42 = vld [vmem:[%s3612_s12 + $0x38] sm:$0xff] }
 0x371   : > { %2426 = vmatprep.subr.mxu0 %v859_v36 }
 0x372   : > { %2427 = vmatpush3.msra.mxu0 %v859_v36 }
 0x373   : > { %2387 = vmatmul.mubr.msk.f32.gmra.mxu0 %vm557_vm0, %v882_v43  ;;  %2428 = vmatprep.subr.mxu0 %v3281_v35 }
 0x374   : > { %2429 = vmatpush3.msra.mxu0 %v3281_v35  ;;  %2389 = vmatprep.mubr.msk.f32.mxu0 %vm557_vm0, %v883_v47 }
 0x375   : > { %2430 = vmatprep.subr.mxu0 %v3286_v24 }
 0x376   : > { %2431 = vmatpush3.msra.mxu0 %v3286_v24 }
 0x377   : > { %2390 = vmatmul.mubr.msk.f32.gmra.mxu0 %vm557_vm0, %v884_v48  ;;  %2432 = vmatprep.subr.mxu0 %v3289_v37  ;;  %v1149_v48 = vld [vmem:[%s3612_s12 + $0x30] sm:$0xff] }
 0x378   : > { %2433 = vmatpush3.msra.mxu0 %v3289_v37  ;;  %2436 = vmatprep.mubr.msk.f32.mxu0 %vm557_vm0, %v1215_v49 }
 0x379   : > { %2434 = vmatprep.subr.mxu0 %v3294_v38 }
 0x37a   : > { %2435 = vmatpush3.msra.mxu0 %v3294_v38 }
 0x37b   : > { %2437 = vmatmul.mubr.msk.f32.vlgmr.msra.gmra.mxu0 %vm557_vm0, %v1216_v50  ;;  %2476 = vmatprep.subr.mxu0 %v868_v32 }
 0x37c   : > { %2477 = vmatpush3.msra.mxu0 %v868_v32  ;;  %2439 = vmatprep.mubr.msk.f32.mxu0 %vm557_vm0, %v1217_v53  ;;  %v1145_v32 = vld [vmem:[%s3612_s12 + $0x10] sm:$0xff] }
 0x37d   : > { %2478 = vmatprep.subr.mxu0 %v865_v34 }
 0x37e   : > { %2479 = vmatpush3.msra.mxu0 %v865_v34 }
 0x37f   : > { %2440 = vmatmul.mubr.msk.f32.gmra.mxu0 %vm557_vm0, %v1218_v54  ;;  %2480 = vmatprep.subr.mxu0 %v3278_v33 }
 0x380   : > { %2481 = vmatpush3.msra.mxu0 %v3278_v33  ;;  %2442 = vmatprep.mubr.msk.f32.mxu0 %vm557_vm0, %v1219_v55 }
 0x381   : > { %2482 = vmatprep.subr.mxu0 %v859_v36 }
 0x382   : > { %2483 = vmatpush3.msra.mxu0 %v859_v36 }
 0x383   : > { %2443 = vmatmul.mubr.msk.f32.gmra.mxu0 %vm557_vm0, %v1220_v56  ;;  %2484 = vmatprep.subr.mxu0 %v3281_v35 }
 0x384   : > { %2485 = vmatpush3.msra.mxu0 %v3281_v35  ;;  %2445 = vmatprep.mubr.msk.f32.mxu0 %vm557_vm0, %v1221_v10  ;;  %v1148_v35 = vld [vmem:[%s3612_s12 + $0x28] sm:$0xff] }
 0x385   : > { %2486 = vmatprep.subr.mxu0 %v3286_v24 }
 0x386   : > { %2487 = vmatpush3.msra.mxu0 %v3286_v24 }
 0x387   : > { %2446 = vmatmul.mubr.msk.f32.gmra.mxu0 %vm557_vm0, %v1222_v13  ;;  %2488 = vmatprep.subr.mxu0 %v3289_v37  ;;  %v1144_v13 = vld [vmem:[%s3612_s12 + $0x8] sm:$0xff] }
 0x388   : > { %2489 = vmatpush3.msra.mxu0 %v3289_v37  ;;  %2492 = vmatprep.mubr.msk.f32.mxu0 %vm557_vm0, %v1553_v57  ;;  %v1147_v37 = vld [vmem:[%s3612_s12 + $0x20] sm:$0xff] }
 0x389   : > { %2490 = vmatprep.subr.mxu0 %v3294_v38 }
 0x38a   : > { %2491 = vmatpush3.msra.mxu0 %v3294_v38 }
 0x38b   : > { %2493 = vmatmul.mubr.msk.f32.vlgmr.msra.gmra.mxu0 %vm557_vm0, %v1554_v11 }
 0x38c   : > { %2495 = vmatprep.mubr.msk.f32.mxu0 %vm557_vm0, %v1555_v17 }
 0x38f   : > { %2496 = vmatmul.mubr.msk.f32.gmra.mxu0 %vm557_vm0, %v1556_v60 }
 0x390   : > { %2498 = vmatprep.mubr.msk.f32.mxu0 %vm557_vm0, %v1557_v61  ;;  %v2410_v23 = vpop.f32.mrf.mxu1 }
 0x392   : > { %v3412_v62 = vpop.f32.mrf.mxu1 }
 0x393   : > { %2499 = vmatmul.mubr.msk.f32.gmra.mxu0 %vm557_vm0, %v1558_v15 }
 0x394   : > { %2501 = vmatprep.mubr.msk.f32.mxu0 %vm557_vm0, %v1559_v21 }
 0x395   : > { %v2413_v63 = vpop.f32.mrf.mxu1 }
 0x397   : > { %2502 = vmatmul.mubr.msk.f32.gmra.mxu0 %vm557_vm0, %v1560_v19  ;;  %v1114_v1 = vpop.f32.mrf.mxu1 }
 0x398   : > { %2548 = vmatprep.mubr.msk.f32.mxu0 %vm557_vm0, %v2922_v0 }
 0x39a   : > { %v2416_v2 = vpop.f32.mrf.mxu1 }
 0x39c   : > { %v1124_v5 = vpop.f32.mrf.mxu1 }
 0x39e   : > { %v2419_v6 = vpop.f32.mrf.mxu1 }
 0x3a0   : > { %v1134_v22 = vpop.f32.mrf.mxu1 }
 0x3a2   : > { %v3414_v25 = vpop.f32.mrf.mxu1 }
 0x3a4   : > { %v3416_v26 = vpop.f32.mrf.mxu1 }
 0x3a6   : > { %v2469_v27 = vpop.f32.mrf.mxu1 }
 0x3a8   : > { %v1452_v28 = vpop.f32.mrf.mxu1 }
 0x3aa   : > { %v2472_v9 = vpop.f32.mrf.mxu1 }
 0x3ac   : > { %v1462_v14 = vpop.f32.mrf.mxu1 }
 0x3ae   : > { %v3420_v29 = vpop.f32.mrf.mxu1 }
 0x3b0   : > { %v3434_v40 = vpop.f32.mrf.mxu1 }
 0x3b2   : > { %v3442_v50 = vpop.f32.mrf.mxu1 }
 0x3b4   : > { %v3447_v61 = vpop.f32.mrf.mxu1 }
 0x42b   : > { %v2382_v7 = vpop.f32.mrf.mxu0 }
 0x42c   : > { %v1110_v54 = vadd.f32 %v2410_v23, %v2382_v7 }
 0x42d   : > { %v3418_v8 = vpop.f32.mrf.mxu0 }
 0x42e   : > { %v1152_v21 = vadd.f32 %v1144_v13, %v1110_v54 }
 0x42f   : > { %v2385_v0 = vpop.f32.mrf.mxu0 }
 0x430   : > { %v1120_v18 = vadd.f32 %v2413_v63, %v2385_v0 }
 0x431   : > { %v985_v12 = vpop.f32.mrf.mxu0 }
 0x432   : > { %v1115_v31 = vadd.f32 %v1114_v1, %v985_v12  ;;  %v1154_v24 = vadd.f32 %v1146_v30, %v1120_v18  ;;  %v2131_v12 = vmul.f32 -1.442695, %v1152_v21 }
 0x433   : > { %v2388_v16 = vpop.f32.mrf.mxu0 }
 0x434   : > { %v1130_v33 = vadd.f32 %v2416_v2, %v2388_v16  ;;  %v1153_v41 = vadd.f32 %v1145_v32, %v1115_v31  ;;  %v2133_v55 = vmul.f32 -1.442695, %v1154_v24  ;;  %v1484_v2 = vld [vmem:[%s3613_s13 + $0x18] sm:$0xff]  ;;  %v1485_v31 = vld [vmem:[%s3613_s13 + $0x20] sm:$0xff] }
 0x435   : > { %v995_v20 = vpop.f32.mrf.mxu0 }
 0x436   : > { %v1125_v36 = vadd.f32 %v1124_v5, %v995_v20  ;;  %v1156_v47 = vadd.f32 %v1148_v35, %v1130_v33  ;;  %v2132_v57 = vmul.f32 -1.442695, %v1153_v41  ;;  %2624 = vpow2.f32 %v2133_v55  ;;  %v1143_v35 = vld [vmem:[%s3612_s12] sm:$0xff] }
 0x437   : > { %v2391_v34 = vpop.f32.mrf.mxu0 }
 0x438   : > { %v1140_v38 = vadd.f32 %v2419_v6, %v2391_v34  ;;  %v1155_v53 = vadd.f32 %v1147_v37, %v1125_v36  ;;  %v2135_v17 = vmul.f32 -1.442695, %v1156_v47  ;;  %2626 = vpow2.f32 %v2132_v57  ;;  %v1486_v6 = vld [vmem:[%s3613_s13 + $0x28] sm:$0xff]  ;;  %v1488_v34 = vld [vmem:[%s3613_s13 + $0x38] sm:$0xff] }
 0x439   : > { %v1005_v39 = vpop.f32.mrf.mxu0 }
 0x43a   : > { %v1135_v43 = vadd.f32 %v1134_v22, %v1005_v39  ;;  %v1158_v56 = vadd.f32 %v1150_v42, %v1140_v38  ;;  %v2134_v15 = vmul.f32 -1.442695, %v1155_v53  ;;  %2628 = vpow2.f32 %v2135_v17  ;;  %v3455_v22 = vpop.f32.mrf.mxu1  ;;  %v1487_v39 = vld [vmem:[%s3613_s13 + $0x30] sm:$0xff] }
 0x43b   : > { %v2438_v49 = vpop.f32.mrf.mxu0 }
 0x43c   : > { %v1157_v11 = vadd.f32 %v1149_v48, %v1135_v43  ;;  %v2137_v19 = vmul.f32 -1.442695, %v1158_v56  ;;  %2630 = vpow2.f32 %v2134_v15  ;;  %v1448_v18 = vadd.f32 %v3414_v25, %v2438_v49  ;;  %v3472_v25 = vpop.f32.mrf.mxu1 }
 0x43d   : > { %v1313_v10 = vpop.f32.mrf.mxu0 }
 0x43e   : > { %v2136_v23 = vmul.f32 -1.442695, %v1157_v11  ;;  %2632 = vpow2.f32 %v2137_v19  ;;  %v1443_v36 = vadd.f32 %v3416_v26, %v1313_v10  ;;  %v2528_v49 = vpop.f32.mrf.mxu1 }
 0x43f   : > { %v2441_v60 = vpop.f32.mrf.mxu0 }
 0x440   : > { %v1458_v1 = vadd.f32 %v2469_v27, %v2441_v60  ;;  %v1483_v27 = vld [vmem:[%s3613_s13 + $0x10] sm:$0xff]  ;;  %2634 = vpow2.f32 %v2136_v23  ;;  %v1800_v15 = vpop.f32.mrf.mxu1 }
 0x441   : > { %v1323_v63 = vpop.f32.mrf.mxu0  ;;  %2636 = vpow2.f32 %v2131_v12 }
 0x442   : > { %v1453_v7 = vadd.f32 %v1452_v28, %v1323_v63  ;;  %v1492_v20 = vadd.f32 %v1484_v2, %v1458_v1  ;;  %v1105_v28 = vadd.f32 %v3412_v62, %v3418_v8  ;;  %v2531_v12 = vpop.f32.mrf.mxu1 }
 0x443   : > { %v2444_v5 = vpop.f32.mrf.mxu0  ;;  %v2625_v13 = vpop.eup %2624 }
 0x444   : > { %v1468_v0 = vadd.f32 %v2472_v9, %v2444_v5  ;;  %v1482_v9 = vld [vmem:[%s3613_s13 + $0x8] sm:$0xff]  ;;  %v1491_v24 = vadd.f32 %v1483_v27, %v1453_v7  ;;  %v2157_v42 = vmul.f32 -1.442695, %v1492_v20  ;;  %v1151_v47 = vadd.f32 %v1143_v35, %v1105_v28 }
 0x445   : > { %v1333_v16 = vpop.f32.mrf.mxu0  ;;  %v1490_v41 = vadd.f32 %v1482_v9, %v1448_v18  ;;  %v2627_v17 = vpop.eup %2626  ;;  %v1186_v23 = vadd.f32 1.0, %v2625_v13  ;;  %v1824_v18 = vld [vmem:[%s3614_s14 + $0x28] sm:$0xff] }
 0x446   : > { %v1494_v30 = vadd.f32 %v1486_v6, %v1468_v0  ;;  %v1463_v32 = vadd.f32 %v1462_v14, %v1333_v16  ;;  %v1481_v14 = vld [vmem:[%s3613_s13] sm:$0xff]  ;;  %v2156_v54 = vmul.f32 -1.442695, %v1491_v24  ;;  %v2130_v60 = vmul.f32 -1.442695, %v1151_v47 }
 0x447   : > { %v2447_v33 = vpop.f32.mrf.mxu0  ;;  %v1489_v53 = vadd.f32 %v1481_v14, %v1443_v36  ;;  %v2155_v57 = vmul.f32 -1.442695, %v1490_v41  ;;  %v2629_v21 = vpop.eup %2628  ;;  %v1185_v5 = vadd.f32 1.0, %v2627_v17  ;;  %v1823_v47 = vld [vmem:[%s3614_s14 + $0x20] sm:$0xff] }
 0x448   : > { %v2159_v62 = vmul.f32 -1.442695, %v1494_v30  ;;  %v1478_v8 = vadd.f32 %v3420_v29, %v2447_v33  ;;  %v1493_v37 = vadd.f32 %v1485_v31, %v1463_v32  ;;  %v1188_v7 = vadd.f32 1.0, %v2629_v21  ;;  %v1826_v33 = vld [vmem:[%s3614_s14 + $0x38] sm:$0xff] }
 0x449   : > { %v1343_v38 = vpop.f32.mrf.mxu0  ;;  %v2154_v19 = vmul.f32 -1.442695, %v1489_v53  ;;  %v2631_v63 = vpop.eup %2630 }
 0x44a   : > { %v1496_v43 = vadd.f32 %v1488_v34, %v1478_v8  ;;  %v1473_v26 = vadd.f32 %v3434_v40, %v1343_v38  ;;  %2638 = vpow2.f32 %v2159_v62  ;;  %v2158_v48 = vmul.f32 -1.442695, %v1493_v37  ;;  %v1810_v34 = vpop.f32.mrf.mxu1  ;;  %v1825_v8 = vld [vmem:[%s3614_s14 + $0x30] sm:$0xff] }
 0x44b   : > { %v3486_v29 = vpop.f32.mrf.mxu0  ;;  %v2633_v2 = vpop.eup %2632  ;;  %v1187_v27 = vadd.f32 1.0, %v2631_v63  ;;  %v1820_v63 = vld [vmem:[%s3614_s14 + $0x8] sm:$0xff] }
 0x44c   : > { %v2161_v55 = vmul.f32 -1.442695, %v1496_v43  ;;  %v1495_v56 = vadd.f32 %v1487_v39, %v1473_v26  ;;  %2640 = vpow2.f32 %v2158_v48  ;;  %v1190_v20 = vadd.f32 1.0, %v2633_v2 }
 0x44d   : > { %v3488_v10 = vpop.f32.mrf.mxu0  ;;  %2642 = vpow2.f32 %v2157_v42  ;;  %v2635_v6 = vpop.eup %2634 }
 0x44e   : > { %v2160_v11 = vmul.f32 -1.442695, %v1495_v56  ;;  %2644 = vpow2.f32 %v2161_v55  ;;  %v3493_v31 = vpop.eup %2636  ;;  %v1189_v28 = vadd.f32 1.0, %v2635_v6  ;;  %v1819_v6 = vld [vmem:[%s3614_s14] sm:$0xff] }
 0x44f   : > { %v2497_v40 = vpop.f32.mrf.mxu0  ;;  %2646 = vpow2.f32 %v2156_v54  ;;  %v1822_v54 = vld [vmem:[%s3614_s14 + $0x18] sm:$0xff] }
 0x450   : > { %2648 = vpow2.f32 %v2160_v11  ;;  %v1796_v26 = vadd.f32 %v3455_v22, %v2497_v40 }
 0x451   : > { %v1661_v1 = vpop.f32.mrf.mxu0  ;;  %2650 = vpow2.f32 %v2155_v57 }
 0x452   : > { %2652 = vpow2.f32 %v2130_v60  ;;  %v1791_v22 = vadd.f32 %v3472_v25, %v1661_v1  ;;  %v1786_v60 = vadd.f32 %v3442_v50, %v3486_v29  ;;  %v1830_v40 = vadd.f32 %v1822_v54, %v1796_v26  ;;  %v2719_v26 = vld [vmem:[%s2943_s18 + $0x20] sm:$0xff] }
 0x453   : > { %v2500_v0 = vpop.f32.mrf.mxu0  ;;  %2654 = vpow2.f32 %v2154_v19  ;;  %v1781_v50 = vadd.f32 %v3447_v61, %v3488_v10 }
 0x454   : > { %v1806_v16 = vadd.f32 %v2528_v49, %v2500_v0  ;;  %2656 = vrcp.f32 %v1186_v23 }
 0x455   : > { %v1671_v30 = vpop.f32.mrf.mxu0  ;;  %2658 = vrcp.f32 %v1185_v5  ;;  %v1828_v5 = vadd.f32 %v1820_v63, %v1786_v60  ;;  %v2722_v63 = vld [vmem:[%s2943_s18 + $0x8] sm:$0xff] }
 0x456   : > { %2660 = vrcp.f32 %v1188_v7  ;;  %v1832_v9 = vadd.f32 %v1824_v18, %v1806_v16  ;;  %v1801_v42 = vadd.f32 %v1800_v15, %v1671_v30  ;;  %v1821_v15 = vld [vmem:[%s3614_s14 + $0x10] sm:$0xff]  ;;  %v1827_v18 = vadd.f32 %v1819_v6, %v1781_v50 }
 0x457   : > { %v2503_v32 = vpop.f32.mrf.mxu0  ;;  %v2639_v35 = vpop.eup %2638  ;;  %2662 = vrcp.f32 %v1187_v27  ;;  %v1829_v29 = vadd.f32 %v1821_v15, %v1791_v22  ;;  %v1184_v27 = vadd.f32 1.0, %v3493_v31  ;;  %v2716_v31 = vld [vmem:[%s2943_s18 + $0x38] sm:$0xff] }
 0x458   : > { %v1816_v36 = vadd.f32 %v2531_v12, %v2503_v32  ;;  %2664 = vrcp.f32 %v1190_v20  ;;  %v1526_v24 = vadd.f32 1.0, %v2639_v35  ;;  %v1831_v11 = vadd.f32 %v1823_v47, %v1801_v42 }
 0x459   : > { %v1681_v62 = vpop.f32.mrf.mxu0  ;;  %v2641_v14 = vpop.eup %2640  ;;  %2666 = vrcp.f32 %v1189_v28 }
 0x45a   : > { %v1834_v37 = vadd.f32 %v1826_v33, %v1816_v36  ;;  %v1811_v38 = vadd.f32 %v1810_v34, %v1681_v62  ;;  %v2643_v39 = vpop.eup %2642  ;;  %v1525_v41 = vadd.f32 1.0, %v2641_v14  ;;  %2668 = vtanh.f32 %v1832_v9  ;;  %v2717_v62 = vld [vmem:[%s2943_s18 + $0x30] sm:$0xff] }
 0x45b   : > { %v2645_v43 = vpop.eup %2644  ;;  %2670 = vrcp.f32 %v1526_v24  ;;  %v1524_v56 = vadd.f32 1.0, %v2643_v39 }
 0x45c   : > { %v1833_v48 = vadd.f32 %v1825_v8, %v1811_v38  ;;  %v2647_v49 = vpop.eup %2646  ;;  %2672 = vrcp.f32 %v1525_v41  ;;  %v1528_v53 = vadd.f32 1.0, %v2645_v43 }
 0x45d   : > { %v2649_v55 = vpop.eup %2648  ;;  %2674 = vtanh.f32 %v1834_v37  ;;  %v1523_v19 = vadd.f32 1.0, %v2647_v49  ;;  %v2718_v37 = vld [vmem:[%s2943_s18 + $0x28] sm:$0xff] }
 0x45e   : > { %v2651_v13 = vpop.eup %2650  ;;  %2676 = vrcp.f32 %v1528_v53  ;;  %v1527_v57 = vadd.f32 1.0, %v2649_v55  ;;  %v2720_v55 = vld [vmem:[%s2943_s18 + $0x18] sm:$0xff] }
 0x45f   : > { %v2653_v17 = vpop.eup %2652  ;;  %2678 = vtanh.f32 %v1833_v48  ;;  %v1522_v25 = vadd.f32 1.0, %v2651_v13 }
 0x460   : > { %v2655_v21 = vpop.eup %2654  ;;  %2680 = vrcp.f32 %v1527_v57  ;;  %v1183_v20 = vadd.f32 1.0, %v2653_v17  ;;  %v2721_v17 = vld [vmem:[%s2943_s18 + $0x10] sm:$0xff] }
 0x461   : > { %v3517_v23 = vpop.eup %2656  ;;  %2682 = vrcp.f32 %v1524_v56  ;;  %v1521_v0 = vadd.f32 1.0, %v2655_v21 }
 0x462   : > { %v3519_v1 = vpop.eup %2658  ;;  %2684 = vtanh.f32 %v1831_v11 }
 0x463   : > { %v2661_v2 = vpop.eup %2660  ;;  %2686 = vtanh.f32 %v1830_v40 }
 0x464   : > { %v2663_v7 = vpop.eup %2662  ;;  %2688 = vrcp.f32 %v1523_v19 }
 0x465   : > { %v2665_v12 = vpop.eup %2664  ;;  %2690 = vrcp.f32 %v1522_v25 }
 0x466   : > { %v2667_v16 = vpop.eup %2666  ;;  %2692 = vtanh.f32 %v1829_v29 }
 0x467   : > { %v2669_v61 = vpop.eup %2668  ;;  %2694 = vtanh.f32 %v1828_v5 }
 0x468   : > { %v2671_v10 = vpop.eup %2670  ;;  %2696 = vrcp.f32 %v1521_v0  ;;  %v1856_v43 = vmul.f32 %v2669_v61, %v2661_v2  ;;  %v2723_v2 = vld [vmem:[%s2943_s18] sm:$0xff]  ;;  %s2013_s18 = scalar_lea.sflag [#allocation3], %s500_s24 }
 0x469   : > { %v2673_v30 = vpop.eup %2672  ;;  %2698 = vrcp.f32 %v1184_v27  ;;  %v1848_v38 = vmul.f32 %v2718_v37, %v2671_v10  ;;  %v2725_v27 = vld [vmem:[%s3602_s2 + $0x18] sm:$0xff] }
 0x46a   : > { %v2675_v28 = vpop.eup %2674  ;;  %2700 = vtanh.f32 %v1827_v18  ;;  %v1847_v47 = vmul.f32 %v2719_v26, %v2673_v30 }
 0x46b   : > { %v2677_v9 = vpop.eup %2676  ;;  %2702 = vrcp.f32 %v1183_v20  ;;  %v1858_v34 = vmul.f32 %v2675_v28, %v2665_v12  ;;  %v1864_v53 = vadd.f32 %v1856_v43, %v1848_v38  ;;  %v2724_v12 = vld [vmem:[%s3602_s2 + $0x8] sm:$0xff] }
 0x46c   : > { %v2679_v32 = vpop.eup %2678  ;;  %v1850_v33 = vmul.f32 %v2716_v31, %v2677_v9 }
 0x46d   : > { %v2681_v35 = vpop.eup %2680  ;;  %v1857_v14 = vmul.f32 %v2679_v32, %v2667_v16 }
 0x46e   : > { %v2683_v36 = vpop.eup %2682  ;;  %v1866_v24 = vadd.f32 %v1858_v34, %v1850_v33  ;;  %v1849_v8 = vmul.f32 %v2717_v62, %v2681_v35 }
 0x46f   : > { %v2685_v39 = vpop.eup %2684  ;;  %v1846_v56 = vmul.f32 %v2720_v55, %v2683_v36 }
 0x470   : > { %v2687_v41 = vpop.eup %2686  ;;  %2532 = vmatprep.subr.mxu0 %v1866_v24  ;;  %2554 = vmatprep.subr.mxu1 %v1866_v24  ;;  %v1865_v42 = vadd.f32 %v1857_v14, %v1849_v8  ;;  %v1855_v54 = vmul.f32 %v2685_v39, %v2663_v7 }
 0x471   : > { %v2689_v48 = vpop.eup %2688  ;;  %2533 = vmatpush3.msra.mxu0 %v1866_v24  ;;  %2562 = vmatpush3.msra.mxu1 %v1866_v24  ;;  %v1854_v11 = vmul.f32 %v2687_v41, %v3517_v23 }
 0x472   : > { %v2691_v49 = vpop.eup %2690  ;;  %2534 = vmatprep.subr.mxu0 %v1865_v42  ;;  %2555 = vmatprep.subr.mxu1 %v1865_v42  ;;  %v1863_v22 = vadd.f32 %v1855_v54, %v1847_v47  ;;  %v1845_v60 = vmul.f32 %v2721_v17, %v2689_v48 }
 0x473   : > { %v2693_v13 = vpop.eup %2692  ;;  %2535 = vmatpush3.msra.mxu0 %v1865_v42  ;;  %2563 = vmatpush3.msra.mxu1 %v1865_v42  ;;  %v1862_v21 = vadd.f32 %v1854_v11, %v1846_v56  ;;  %v1844_v25 = vmul.f32 %v2722_v63, %v2691_v49 }
 0x474   : > { %v2695_v57 = vpop.eup %2694  ;;  %2536 = vmatprep.subr.mxu0 %v1864_v53  ;;  %2556 = vmatprep.subr.mxu1 %v1864_v53  ;;  %v1853_v19 = vmul.f32 %v2693_v13, %v3519_v1 }
 0x475   : > { %v2697_v40 = vpop.eup %2696  ;;  %2537 = vmatpush3.msra.mxu0 %v1864_v53  ;;  %2564 = vmatpush3.msra.mxu1 %v1864_v53 }
 0x476   : > { %v2699_v15 = vpop.eup %2698  ;;  %2538 = vmatprep.subr.mxu0 %v1863_v22  ;;  %2557 = vmatprep.subr.mxu1 %v1863_v22  ;;  %v1861_v23 = vadd.f32 %v1853_v19, %v1845_v60  ;;  %v1843_v5 = vmul.f32 %v2723_v2, %v2697_v40 }
 0x477   : > { %v2701_v50 = vpop.eup %2700  ;;  %2539 = vmatpush3.msra.mxu0 %v1863_v22  ;;  %2565 = vmatpush3.msra.mxu1 %v1863_v22  ;;  %v1852_v29 = vmul.f32 %v2699_v15, %v2695_v57 }
 0x478   : > { %2540 = vmatprep.subr.mxu0 %v1862_v21  ;;  %2558 = vmatprep.subr.mxu1 %v1862_v21  ;;  %v2703_v6 = vpop.eup %2702 }
 0x479   : > { %2541 = vmatpush3.msra.mxu0 %v1862_v21  ;;  %2566 = vmatpush3.msra.mxu1 %v1862_v21  ;;  %v1860_v7 = vadd.f32 %v1852_v29, %v1844_v25  ;;  %v1851_v0 = vmul.f32 %v2703_v6, %v2701_v50 }
 0x47a   : > { %2542 = vmatprep.subr.mxu0 %v1861_v23  ;;  %2559 = vmatprep.subr.mxu1 %v1861_v23 }
 0x47b   : > { %2543 = vmatpush3.msra.mxu0 %v1861_v23  ;;  %2567 = vmatpush3.msra.mxu1 %v1861_v23  ;;  %v1859_v1 = vadd.f32 %v1851_v0, %v1843_v5 }
 0x47c   : > { %2544 = vmatprep.subr.mxu0 %v1860_v7  ;;  %2560 = vmatprep.subr.mxu1 %v1860_v7 }
 0x47d   : > { %2545 = vmatpush3.msra.mxu0 %v1860_v7  ;;  %2568 = vmatpush3.msra.mxu1 %v1860_v7 }
 0x47e   : > { %2546 = vmatprep.subr.mxu0 %v1859_v1  ;;  %2561 = vmatprep.subr.mxu1 %v1859_v1 }
 0x47f   : > { %2547 = vmatpush3.msra.mxu0 %v1859_v1  ;;  %2569 = vmatpush3.msra.mxu1 %v1859_v1 }
 0x480   : > { %2549 = vmatmul.mubr.msk.f32.vlgmr.msra.gmra.mxu0 %vm557_vm0, %v2724_v12  ;;  %2552 = vmatmul.mubr.msk.f32.vlgmr.msra.gmra.mxu1 %vm557_vm0, %v2725_v27 }
 0x540   : > { %v2550_v16 = vpop.f32.mrf.mxu0  ;;  %v2553_v61 = vpop.f32.mrf.mxu1 }
 0x541   : > { %1959 = vperm.xlu0 %2610, %v2550_v16  }
 0x542   : > { %v1933_v18 = vpop.f32.mrf.mxu0  ;;  %v1943_v10 = vpop.f32.mrf.mxu1 }
 0x543   : > { %1954 = vperm.xlu1 %2611, %v1933_v18  }
 0x547   : > { %1964 = vperm.xlu1 %2611, %v1943_v10  }
 0x54b   : > { %1969 = vperm.xlu1 %2611, %v2553_v61  }
 0x5bc   : > { %v1960_v20 = vpop.permute.xlu0 %1959 }
 0x5bd   : > { %v1973_v30 = vadd.f32 %v1960_v20, %v3089_v44 }
 0x5be   : > { %v1955_v28 = vpop.permute.xlu1 %1954 }
 0x5bf   : > { %v1972_v9 = vadd.f32 %v1955_v28, %v3091_v46  ;;  %2704 = vtanh.f32 %v1973_v30 }
 0x5c1   : > { %2706 = vtanh.f32 %v1972_v9 }
 0x5c2   : > { %v1965_v32 = vpop.permute.xlu1 %1964 }
 0x5c3   : > { %v1974_v31 = vadd.f32 %v1965_v32, %v3097_v52 }
 0x5c5   : > { %2708 = vtanh.f32 %v1974_v31 }
 0x5c6   : > { %v1970_v33 = vpop.permute.xlu1 %1969 }
 0x5c7   : > { %v1975_v34 = vadd.f32 %v1970_v33, %v3095_v51 }
 0x5c9   : > { %2710 = vtanh.f32 %v1975_v34 }
 0x5cc   : > { %v2705_v35 = vpop.eup %2704 }
 0x5cd   : > { %v1981_v62 = vmul.f32 %v2705_v35, %v3101_v58 }
 0x5ce   : > { %v2707_v36 = vpop.eup %2706 }
 0x5cf   : > { %v1980_v24 = vmul.f32 %v2707_v36, %v3103_v59  ;;  %v1985_v14 = vsel %vm812_vm1, %v1981_v62, 0.0 }
 0x5d1   : > { %v1984_v46 = vsel %vm812_vm1, %v1980_v24, 0.0 }
 0x5d2   : > { %v2709_v44 = vpop.eup %2708  ;;  %v1986_v38 = vadd.f32 %v1985_v14, %v1984_v46 }
 0x5d3   : > { %v1982_v8 = vmul.f32 %v2709_v44, %v3110_v4 }
 0x5d5   : > { %v1987_v52 = vsel %vm812_vm1, %v1982_v8, 0.0 }
 0x5d6   : > { %v2711_v37 = vpop.eup %2710  ;;  %v1988_v39 = vadd.f32 %v1987_v52, %v1986_v38 }
 0x5d7   : > { %v1983_v51 = vmul.f32 %v2711_v37, %v3108_v3 }
 0x5d9   : > { %v1989_v41 = vsel %vm812_vm1, %v1983_v51, 0.0 }
 0x5da   : > { %v1990_v42 = vadd.f32 %v1989_v41, %v1988_v39 }
 0x5dc   : > { %v1991_v59 = vrot.slane %v1990_v42, 4 }
 0x5de   : > { %v1992_v43 = vadd.f32 %v1991_v59, %v1990_v42 }
 0x5e0   : > { %v1993_v58 = vrot.slane %v1992_v43, 2 }
 0x5e2   : > { %v1994_v26 = vadd.f32 %v1993_v58, %v1992_v43 }
 0x5e4   : > { %v1995_v4 = vrot.slane %v1994_v26, 1 }
 0x5e6   : > { %v1996_v47 = vadd.f32 %v1995_v4, %v1994_v26 }
 0x5e8   : > { %v1997_v48 = vsel %vm812_vm1, %v1996_v47, -inf }
 0x5e9   : > { %1998 = vmax.xlane.f32.xlu0 %v1997_v48 }
 0x672   : > { %v1999_v49 = vpop.xlane.xlu0 %1998 }
 0x673   : > { %v2000_v53 = vsub.f32 %v1996_v47, %v1999_v49 }
 0x675   : > { %v2001_v54 = vmul.f32 1.442695, %v2000_v53 }
 0x677   : > { %2712 = vpow2.f32 %v2001_v54 }
 0x684   : > { %v2713_v3 = vpop.eup %2712 }
 0x685   : > { %v2003_v55 = vsel %vm812_vm1, %v2713_v3, 0.0 }
 0x686   : > { %2004 = vadd.xlane.f32.xlu1 %v2003_v55 }
 0x70f   : > { %v2005_v56 = vpop.xlane.xlu1 %2004 }
 0x710   : > { %2714 = vrcp.f32 %v2005_v56 }
 0x71d   : > { %v2715_v13 = vpop.eup %2714 }
 0x71e   : > { %v2007_v57 = vmul.f32 %v2715_v13, %v2713_v3 }
 0x720   : > { %v2009_v22 = vsel %vm2008_vm2, %v3119_v45, %v2007_v57 }
 0x721   : > { %2011 = vst.msk [vmem:[%s502_s17] sm:$0x3] %vm2010_vm3, %v2009_v22 }
 0x722   : > { %2739 = shalt.err (!%p2736_p3)
}
 0x723   : > { %s2740_s29 = scalar_lea.hbm %s3564_s25, 32  ;;  %s2744_s17 = scalar_lea.hbm %s3615_s15, 64 }
 0x724   : > { %p2741_p4 = scmp.ne.s32.totalorder %s3564_s25, %s2740_s29  ;;  %p2745_p9 = scmp.lt.s32.totalorder %s3564_s25, %s3615_s15 }
 0x725   : > { %p2746_p10 = scmp.lt.s32.totalorder %s2744_s17, %s2740_s29 }
 0x726   : > { %p2742_p7 = pnand %p2741_p4, %p2908_p5 }
 0x727   : > { %p2747_p11 = por %p2746_p10, %p2745_p9 }
 0x728   : > { %p2743_p8 = pneg %p2742_p7 }
 0x72a   : > { %p2748_p12 = pnand %p2747_p11, %p2743_p8 }
 0x72c   : > { %2751 = shalt.err (!%p2748_p12)
}
 0x72d   : > { %2570 = dma.vmem_to_hbm [thread:$0]  (%p2908_p5), %s2027_s23, 32, %s3564_s25, %s2013_s18  }
 0x72e PF: > { %s3630_s30 = sld [smem:[#allocation7_spill]] }
 0x72f   : > { %s3631_s22 = sld [smem:[#allocation5_spill]] }
 0x734   : > { %p2576_p13 = scmp.ge.s32.totalorder %s3630_s30, 2 }
 0x735   : > { %s2038_s21 = sand.u32 1, %s3631_s22  }
 0x736   : > { %p2573_p0 = pnand %p2576_p13, %p2912_p6  ;;  %s2039_s24 = scalar_lea.sflag [#allocation3], %s2038_s21 }
 0x738   : > { %p2574_p1 = pneg %p2573_p0 }
 0x73a   : > { %2769 = dma.done.wait (%p2574_p1), %s2039_s24, 32  }
 0x73b   : > { %2771 = vsyncadd (%p2574_p1), %s2039_s24, 4294967264  ;;  %s3633_s21 = sld [smem:[#allocation8_spill]]  ;;  %s3636_s18 = smov %s2778_s19 }
 0x73c   : > { %s3634_s29 = sld [smem:[#allocation6_spill]] }
 0x73d   : > { %s3635_s20 = sld [smem:[#allocation9_spill]] }
 0x741   : > { %p25_p2 = scmp.ge.s32.totalorder %s3633_s21, 4  }
 0x742   : > { %s3637_s19 = smov %s3634_s29 }
 0x743   :  { %27 = sbr.rel (!%p25_p2) target bundleno = 3 (0x3), region = 118 }
 0x748   :  { %2044 = vsyncpa [#allocation3], 1 }
 0x749   :  { %2046 = vsyncpa [#allocation3 + $0x1], 1 }

</bundles_post_ra>
